<compile_context>
chip_gen: v7x
topology: tpu7x:2x2x1
jax: 0.10.0
libtpu: 0.0.40
codegen_flags: <defaults>
</compile_context>

<pallas_src>
import functools
import math

import jax
import jax.numpy as jnp
from jax.experimental import pallas as pl
from jax.experimental.pallas import tpu as pltpu


def _round_up(x, m):
    return ((x + m - 1) // m) * m


def _pos_emb_kernel(freq_ref, phase_ref, t_ref, o_ref, *, scale):
    # freq_ref : (1, D) resident table, [freqs | freqs].
    # phase_ref: (1, D) resident table, [0...0 | pi/2...pi/2].
    # t_ref    : (TILE_N, 1) f32 timestep column for this row tile.
    # o_ref    : (TILE_N, D) output block.
    t = t_ref[...] * scale                       # (TILE_N, 1); matches ref order
    emb = t * freq_ref[...] + phase_ref[...]     # (TILE_N, D)
    # cos(x) == sin(x + pi/2): one unmasked full-width store, one sin pass.
    o_ref[...] = jnp.sin(emb).astype(o_ref.dtype)


def positional_embedding(timesteps, embedding_dim, scale, *,
                         tile_n=None, out_dtype=jnp.float32):
    """Pallas equivalent of PositionalEmbedding.forward."""
    assert timesteps.ndim == 1
    assert embedding_dim % 2 == 0, "embedding_dim must be even"
    half_dim = embedding_dim // 2
    assert half_dim > 1, "embedding_dim must be >= 4 (log-coef divides by half_dim-1)"

    n = timesteps.shape[0]
    out_itemsize = jnp.dtype(out_dtype).itemsize

    # ---- Row-tile selection -------------------------------------------------
    if tile_n is None:
        # ~4 MiB output block amortizes the ~0.35 us per-grid-step overhead at
        # small D and stays inside every chip's scoped VMEM at large D.
        tile_n = (4 * 1024 * 1024) // max(1, embedding_dim * out_itemsize)
        tile_n = max(8, min(int(tile_n), 4096))
        # v7x megacore: give the "parallel" axis >= 2 grid steps when n allows.
        if n > 16:
            tile_n = min(tile_n, _round_up(pl.cdiv(n, 2), 8))
    tile_n = _round_up(max(8, min(int(tile_n), _round_up(n, 8))), 8)

    grid = (pl.cdiv(n, tile_n),)
    n_pad = grid[0] * tile_n

    # ---- Resident frequency / phase tables (built with the same XLA ops as
    # the reference so the sin/cos arguments match bit-for-bit) --------------
    log_coef = math.log(10000.0) / (half_dim - 1)
    freqs = jnp.exp(jnp.arange(half_dim, dtype=jnp.float32) * (-log_coef))
    freq_full = jnp.concatenate([freqs, freqs]).reshape(1, embedding_dim)
    phase = jnp.concatenate(
        [jnp.zeros((half_dim,), jnp.float32),
         jnp.full((half_dim,), math.pi / 2, dtype=jnp.float32)],
    ).reshape(1, embedding_dim)

    # Only the tiny (n, 1) column gets padded (deterministic zeros for the
    # last block's OOB rows); the (n, D) output is written directly — Pallas
    # masks the out-of-bounds rows of the final block, so no out[:n] re-copy.
    t2 = timesteps.astype(jnp.float32).reshape(n, 1)
    if n_pad != n:
        t2 = jnp.pad(t2, ((0, n_pad - n), (0, 0)))

    # VMEM budget: double-buffered output + lane-padded (tile_n, 128) input
    # column double buffer + resident tables.
    vmem_bytes = (2 * tile_n * embedding_dim * out_itemsize   # output bufs
                  + 2 * tile_n * 128 * 4                      # padded input bufs
                  + 2 * embedding_dim * 4                     # tables
                  + (1 << 20))                                # headroom
    vmem_limit = int(min(max(vmem_bytes, 16 << 20), 32 << 20))

    kernel = functools.partial(_pos_emb_kernel, scale=float(scale))

    return pl.pallas_call(
        kernel,
        out_shape=jax.ShapeDtypeStruct((n, embedding_dim), out_dtype),
        grid=grid,
        in_specs=[
            pl.BlockSpec((1, embedding_dim), lambda i: (0, 0)),   # freqs (resident)
            pl.BlockSpec((1, embedding_dim), lambda i: (0, 0)),   # phase (resident)
            pl.BlockSpec((tile_n, 1), lambda i: (i, 0)),          # timesteps column
        ],
        out_specs=pl.BlockSpec((tile_n, embedding_dim), lambda i: (i, 0)),
        compiler_params=pltpu.CompilerParams(
            dimension_semantics=("parallel",),
            vmem_limit_bytes=vmem_limit),
        cost_estimate=pl.CostEstimate(
            flops=2 * n * embedding_dim + n,
            transcendentals=n * embedding_dim,
            bytes_accessed=(n * embedding_dim * out_itemsize
                            + n_pad * 4 + 2 * embedding_dim * 4)),
    )(freq_full, phase, t2)


def _reference(timesteps, embedding_dim, scale):
    """Pure-JAX mirror of the torch forward, for verification."""
    half_dim = embedding_dim // 2
    t = timesteps.astype(jnp.float32) * scale
    emb = math.log(10000.0) / (half_dim - 1)
    emb = jnp.exp(jnp.arange(half_dim, dtype=jnp.float32) * -emb)
    emb = t[:, None] * emb[None, :]
    return jnp.concatenate([jnp.sin(emb), jnp.cos(emb)], axis=1)


if __name__ == "__main__":
    key = jax.random.PRNGKey(0)
    n = 300                 # non-multiple of the tile -> exercises masked last block
    embedding_dim = 128     # lane-dense output rows
    timesteps = jax.random.uniform(key, (n,), dtype=jnp.float32)

    # Realistic diffusion setting: scale=1000 pushes sin/cos arguments to
    # ~1e3 rad.  The frequency table now matches the reference bit-for-bit;
    # the only extra error source is cos(x)=sin(x+pi/2) argument rounding
    # (~x * 2^-24 ~= 6e-5 rad), well inside the tolerance.
    scale = 1000.0
    out = jax.block_until_ready(
        positional_embedding(timesteps, embedding_dim, scale, tile_n=128))
    ref = _reference(timesteps, embedding_dim, scale)
    assert out.shape == (n, embedding_dim)
    assert out.dtype == jnp.float32
    assert jnp.allclose(out, ref, atol=5e-4, rtol=1e-5), \
        float(jnp.max(jnp.abs(out - ref)))

    # Small-argument check at tight tolerance, auto tile_n (>= 2 grid steps).
    out1 = jax.block_until_ready(
        positional_embedding(timesteps, embedding_dim, 1.0))
    ref1 = _reference(timesteps, embedding_dim, 1.0)
    assert jnp.allclose(out1, ref1, atol=2e-5, rtol=1e-5), \
        float(jnp.max(jnp.abs(out1 - ref1)))

    print("KERNEL_OK")
</pallas_src>

<mosaic_0001>
module attributes {stable_mosaic.version = 11 : i64} {
  func.func @_pos_emb_kernel(%arg0: i32, %arg1: memref<1x128xf32, #tpu.memory_space<vmem>>, %arg2: memref<1x128xf32, #tpu.memory_space<vmem>>, %arg3: memref<128x1xf32, #tpu.memory_space<vmem>>, %arg4: memref<128x128xf32, #tpu.memory_space<vmem>>) attributes {dimension_semantics = [#tpu.dimension_semantics<parallel>], iteration_bounds = array<i64: 3>, scalar_prefetch = 0 : i64, scratch_operands = 0 : i64, tpu.core_type = #tpu.core_type<tc>, window_params = [{pipeline_mode = #tpu.pipeline_mode<synchronous>, transform_indices = @transform_0, window_bounds = array<i64: 1, 128>}, {pipeline_mode = #tpu.pipeline_mode<synchronous>, transform_indices = @transform_1, window_bounds = array<i64: 1, 128>}, {transform_indices = @transform_2, window_bounds = array<i64: 128, 1>}, {transform_indices = @transform_3, window_bounds = array<i64: 128, 128>}]} {
    %c0 = arith.constant 0 : index
    %c0_0 = arith.constant 0 : index
    %0 = vector.load %arg3[%c0, %c0_0] : memref<128x1xf32, #tpu.memory_space<vmem>>, vector<128x1xf32>
    %cst = arith.constant 1.000000e+03 : f32
    %1 = vector.broadcast %cst : f32 to vector<128x1xf32>
    %2 = arith.mulf %0, %1 : vector<128x1xf32>
    %c0_1 = arith.constant 0 : index
    %c0_2 = arith.constant 0 : index
    %3 = vector.load %arg1[%c0_1, %c0_2] : memref<1x128xf32, #tpu.memory_space<vmem>>, vector<1x128xf32>
    %4 = vector.broadcast %2 : vector<128x1xf32> to vector<128x128xf32>
    %5 = vector.broadcast %3 : vector<1x128xf32> to vector<128x128xf32>
    %6 = arith.mulf %4, %5 : vector<128x128xf32>
    %c0_3 = arith.constant 0 : index
    %c0_4 = arith.constant 0 : index
    %7 = vector.load %arg2[%c0_3, %c0_4] : memref<1x128xf32, #tpu.memory_space<vmem>>, vector<1x128xf32>
    %8 = vector.broadcast %7 : vector<1x128xf32> to vector<128x128xf32>
    %9 = arith.addf %6, %8 : vector<128x128xf32>
    %10 = math.sin %9 : vector<128x128xf32>
    %c0_5 = arith.constant 0 : index
    %c0_6 = arith.constant 0 : index
    %11 = vector.load %arg4[%c0_5, %c0_6] : memref<128x128xf32, #tpu.memory_space<vmem>>, vector<128x128xf32>
    tpu.vector_store %arg4[%c0_5, %c0_6], %10 {strides = array<i32>} : memref<128x128xf32, #tpu.memory_space<vmem>>, vector<128x128xf32>,
    return
  }
  func.func @transform_0(%arg0: i32) -> (i32, i32) {
    %c0_i32 = arith.constant 0 : i32
    %c0_i32_0 = arith.constant 0 : i32
    %c0_i32_1 = arith.constant 0 : i32
    return %c0_i32, %c0_i32_0 : i32, i32
  }
  func.func @transform_1(%arg0: i32) -> (i32, i32) {
    %c0_i32 = arith.constant 0 : i32
    %c0_i32_0 = arith.constant 0 : i32
    %c0_i32_1 = arith.constant 0 : i32
    return %c0_i32, %c0_i32_0 : i32, i32
  }
  func.func @transform_2(%arg0: i32) -> (i32, i32) {
    %c0_i32 = arith.constant 0 : i32
    %c0_i32_0 = arith.constant 0 : i32
    return %arg0, %c0_i32 : i32, i32
  }
  func.func @transform_3(%arg0: i32) -> (i32, i32) {
    %c0_i32 = arith.constant 0 : i32
    %c0_i32_0 = arith.constant 0 : i32
    return %arg0, %c0_i32 : i32, i32
  }
}

</mosaic_0001>

<bundles_post_ra>
// kernel: tpu_custom_call.1
= control target key start
LH: loop header
LB: loop body
LE: loop exit
PB: predicated region body
PF: predicated region fallthrough
CT: control target
= control target key end

     0   :  { %8 = vsyncpa [#allocation3], 0  ;;  %s3847_s0 = inlined_call_operand.vmem [shape: f32[1,128], index: 0, kind: input, shape index: {}]   ;;  %s3848_s1 = inlined_call_operand.vmem [shape: f32[1,128], index: 1, kind: input, shape index: {}]   ;;  %s3849_s2 = inlined_call_operand.vmem [shape: f32[384,1], index: 2, kind: input, shape index: {}]   ;;  %s3850_s3 = inlined_call_operand.hbm [shape: f32[300,128], index: 3, kind: output, shape index: {}]  }
   0x1   :  { %10 = vsyncpa [#allocation3 + $0x1], 0  ;;  %s2454_s12 = smov 0   ;;  %s2456_s13 = smov 0  }
   0x2   :  { %s2458_s14 = smov 0   ;;  %s2460_s15 = smov 0  }
   0x3 LB: > { %s2475_s16 = sadd.s32 4294967295, %s2422_s15   ;;  %s2096_s17 = sadd.s32 4294967294, %s2422_s15   ;;  %s2422_s15 = sphi %s2460_s15, %s3884_s15   ;;  %s2418_s14 = sphi %s2458_s14, %s3883_s14   ;;  %s2414_s13 = sphi %s2456_s13, %s3882_s13   ;;  %s2410_s12 = sphi %s2454_s12, %s3881_s12  }
   0x4   : > { %s2479_s18 = sadd.s32 1, %s2422_s15   ;;  %s91_s19 = sadd.s32 1, %s2418_s14 }
   0x5   : > { %s88_s20 = ssub.s32 %s2422_s15, %s2479_s18  ;;  %p101_p0 = scmp.ne.s32.totalorder %s2418_s14, %s2414_s13 }
   0x6   : > { %p89_p1 = scmp.eq.s32.totalorder %s88_s20, 0  ;;  %p102_p2 = scmp.eq.s32.totalorder %s2475_s16, 2 }
   0x7   : > { %p107_p3 = scmp.ne.s32.totalorder %s2414_s13, %s2410_s12  ;;  %p108_p4 = scmp.eq.s32.totalorder %s2096_s17, 2 }
   0x8   : > { %s2490_s21 = scalar_select %p89_p1, %s2418_s14, %s91_s19  }
   0x9   : > { %p2492_p5 = por %p102_p2, %p101_p0  ;;  %p2496_p6 = por %p108_p4, %p107_p3 }
   0xa   : > { %p2099_p7 = scmp.ge.s32.totalorder %s2422_s15, 1  ;;  %p141_p8 = scmp.lt.s32.totalorder %s2422_s15, 4 }
   0xc   : > { %p142_p9 = pnand %p2099_p7, %p141_p8 }
   0xd   : > { %s2503_s24 = sshll.u32 (!%p142_p9), %s2475_s16, 4  ;;  %v2424_v0 = vmov (!%p142_p9), 0   ;;  %s162_s30 = sand.u32 (!%p142_p9), 1, %s2414_s13   ;;  %v2532_v33 = vld [vmem:[%s3847_s0] ss:$0 sm:$0xff] (!%p142_p9) }
   0xe   : > { %145 = sbr.rel (%p142_p9) target bundleno = 624 (0x270), region = 32  ;;  %2291 = vset.pattern.permute.xlu1 (!%p142_p9), %v2424_v0  ;;  %2290 = vset.pattern.permute.xlu0 (!%p142_p9), %v2424_v0  ;;  %p166_p10 = scmp.lt.s32.totalorder (!%p142_p9), %s2503_s24, 47  ;;  %v2537_v34 = vld [vmem:[%s3848_s1] ss:$0 sm:$0xff] (!%p142_p9) }
   0xf   : > { %s2100_s8 = sshll.u32 (!%p142_p9), %s162_s30, 7  ;;  %s3786_s28 = scalar_lea.sflag (!%p142_p9), [#allocation3], %s162_s30 }
  0x10   : > { %s2819_s9 = scalar_lea.vmem (!%p142_p9), [#allocation2], %s2100_s8 }
  0x15   : > { %s167_s25 = scalar_select %p166_p10, %s2503_s24, 47 }
  0x17   : > { %s2102_s26 = sshll.u32 %s167_s25, 3 }
  0x18   : > { %s2510_s29 = scalar_lea.vmem %s3849_s2, %s2102_s26 }
  0x19   : > { %v178_v1 = vld [vmem:[%s2510_s29 + $0x10] sm:$0xff]  ;;  %v176_v2 = vld [vmem:[%s2510_s29] sm:$0xff]  ;;  %v179_v3 = vld [vmem:[%s2510_s29 + $0x18] sm:$0xff] }
  0x1a   : > { %v194_v4 = vmul.f32 1000.0, %v178_v1  ;;  %v192_v5 = vmul.f32 1000.0, %v176_v2  ;;  %v177_v6 = vld [vmem:[%s2510_s29 + $0x8] sm:$0xff]  ;;  %v195_v7 = vmul.f32 1000.0, %v179_v3  ;;  %v180_v10 = vld [vmem:[%s2510_s29 + $0x20] sm:$0xff]  ;;  %v183_v13 = vld [vmem:[%s2510_s29 + $0x38] sm:$0xff] }
  0x1b   : > { %v193_v8 = vmul.f32 1000.0, %v177_v6  ;;  %v181_v9 = vld [vmem:[%s2510_s29 + $0x28] sm:$0xff]  ;;  %v196_v12 = vmul.f32 1000.0, %v180_v10  ;;  %v182_v14 = vld [vmem:[%s2510_s29 + $0x30] sm:$0xff]  ;;  %v199_v15 = vmul.f32 1000.0, %v183_v13  ;;  %v184_v18 = vld [vmem:[%s2510_s29 + $0x40] sm:$0xff] }
  0x1c   : > { %221 = vperm.xlu1 %2291, %v194_v4   ;;  %211 = vperm.xlu0 %2290, %v192_v5   ;;  %v197_v11 = vmul.f32 1000.0, %v181_v9  ;;  %v198_v16 = vmul.f32 1000.0, %v182_v14  ;;  %v185_v17 = vld [vmem:[%s2510_s29 + $0x48] sm:$0xff]  ;;  %v200_v20 = vmul.f32 1000.0, %v184_v18  ;;  %v187_v21 = vld [vmem:[%s2510_s29 + $0x58] sm:$0xff]  ;;  %v186_v22 = vld [vmem:[%s2510_s29 + $0x50] sm:$0xff] }
  0x1d   : > { %v201_v19 = vmul.f32 1000.0, %v185_v17  ;;  %v203_v23 = vmul.f32 1000.0, %v187_v21  ;;  %v202_v24 = vmul.f32 1000.0, %v186_v22  ;;  %v189_v25 = vld [vmem:[%s2510_s29 + $0x68] sm:$0xff]  ;;  %v188_v26 = vld [vmem:[%s2510_s29 + $0x60] sm:$0xff]  ;;  %v191_v29 = vld [vmem:[%s2510_s29 + $0x78] sm:$0xff] }
  0x1e   : > { %v205_v27 = vmul.f32 1000.0, %v189_v25  ;;  %v204_v28 = vmul.f32 1000.0, %v188_v26  ;;  %v190_v30 = vld [vmem:[%s2510_s29 + $0x70] sm:$0xff]  ;;  %v207_v31 = vmul.f32 1000.0, %v191_v29  ;;  %v2427_v13 = vmov 2131351028  }
  0x1f   : > { %v206_v32 = vmul.f32 1000.0, %v190_v30  ;;  %v2429_v17 = vmov 920167782   ;;  %s2023_s29 = ssub.s32 (%p2492_p5), 38, %s2503_s24 }
  0x20   : > { %226 = vperm.xlu1 %2291, %v195_v7   ;;  %216 = vperm.xlu0 %2290, %v193_v8   ;;  %v2425_v7 = vmov 683565275   ;;  %p2024_p11 = scmp.lt.s32.totalorder (%p2492_p5), %s2023_s29, 16 }
  0x24   : > { %236 = vperm.xlu1 %2291, %v197_v11   ;;  %231 = vperm.xlu0 %2290, %v196_v12   ;;  %v2426_v11 = vmov 2475754826  }
  0x28   : > { %246 = vperm.xlu1 %2291, %v199_v15   ;;  %241 = vperm.xlu0 %2290, %v198_v16   ;;  %v2428_v15 = vmov 2102212464  }
  0x2c   : > { %256 = vperm.xlu1 %2291, %v201_v19   ;;  %251 = vperm.xlu0 %2290, %v200_v20  }
  0x30   : > { %266 = vperm.xlu1 %2291, %v203_v23   ;;  %261 = vperm.xlu0 %2290, %v202_v24   ;;  %v2430_v24 = vmov 1326507024  }
  0x34   : > { %276 = vperm.xlu1 %2291, %v205_v27   ;;  %271 = vperm.xlu0 %2290, %v204_v28  }
  0x38   : > { %286 = vperm.xlu1 %2291, %v207_v31   ;;  %281 = vperm.xlu0 %2290, %v206_v32  }
  0x9b   : > { %v222_v35 = vpop.permute.xlu1 %221  ;;  %v212_v36 = vpop.permute.xlu0 %211 }
  0x9c   : > { %v297_v37 = vmul.f32 %v2532_v33, %v222_v35  ;;  %v295_v38 = vmul.f32 %v2532_v33, %v212_v36 }
  0x9e   : > { %v2542_v39 = vadd.f32 %v2537_v34, %v297_v37  ;;  %v2545_v40 = vadd.f32 %v2537_v34, %v295_v38 }
  0x9f   : > { %v227_v41 = vpop.permute.xlu1 %226  ;;  %v217_v59 = vpop.permute.xlu0 %216 }
  0xa0   : > { %v542_v42 = vand.u32 2147483647, %v2542_v39  ;;  %v545_v43 = vand.u32 2139095040, %v2542_v39  ;;  %v334_v44 = vand.u32 2147483647, %v2545_v40  ;;  %v337_v45 = vand.u32 2139095040, %v2545_v40 }
  0xa1   : > { %v298_v47 = vmul.f32 %v2532_v33, %v227_v41  ;;  %v2561_v1 = vmul.f32 %v2532_v33, %v217_v59  ;;  %vm544_vm13 = vcmp.lt.s32.totalorder %v2542_v39, 0  ;;  %vm336_vm14 = vcmp.lt.s32.totalorder %v2545_v40, 0 }
  0xa2   : > { %v546_v46 = vshrl.u32 %v545_v43, 23  ;;  %v549_v48 = vand.u32 8388607, %v542_v42  ;;  %v338_v49 = vshrl.u32 %v337_v45, 23  ;;  %v341_v50 = vand.u32 8388607, %v334_v44 }
  0xa3   : > { %v2557_v52 = vadd.f32 %v2537_v34, %v298_v47 }
  0xa4   : > { %v2113_v51 = vadd.s32 4294967169, %v546_v46  ;;  %v2105_v53 = vadd.s32 4294967169, %v338_v49  ;;  %v550_v55 = vor.u32 8388608, %v549_v48  ;;  %v342_v56 = vor.u32 8388608, %v341_v50 }
  0xa5   : > { %v649_v58 = vand.u32 2139095040, %v2557_v52  ;;  %v646_v5 = vand.u32 2147483647, %v2557_v52 }
  0xa6   : > { %v552_v54 = vadd.s32 1, %v2113_v51  ;;  %v344_v57 = vadd.s32 1, %v2105_v53  ;;  %v2563_v2 = vshll.u32 %v550_v55, 8  ;;  %v2567_v4 = vshll.u32 %v342_v56, 8 }
  0xa7   : > { %v650_v61 = vshrl.u32 %v649_v58, 23 }
  0xa8   : > { %vm553_vm0 = vcmp.gt.s32.totalorder %v552_v54, 0  ;;  %vm345_vm1 = vcmp.gt.s32.totalorder %v344_v57, 0 }
  0xa9   : > { %v554_v60 = vsel %vm553_vm0, %v552_v54, 0  ;;  %v346_v0 = vsel %vm345_vm1, %v344_v57, 0  ;;  %v2571_v10 = vadd.s32 4294967169, %v650_v61  ;;  %vm2679_vm1 = vcmp.le.f32.partialorder %v542_v42, 0.7853982 }
  0xaa   : > { %v555_v62 = vshrl.u32 %v554_v60, 5  ;;  %v556_v63 = vand.u32 31, %v554_v60  ;;  %v2565_v3 = vshrl.u32 %v346_v0, 5  ;;  %v348_v9 = vand.u32 31, %v346_v0 }
  0xac   : > { %v557_v6 = vsub.s32 32, %v556_v63  ;;  %v559_v8 = vshll.u32 %v2425_v7, %v556_v63  ;;  %v562_v12 = vshll.u32 %v2426_v11, %v556_v63  ;;  %v565_v14 = vshll.u32 %v2427_v13, %v556_v63 }
  0xad   : > { %v568_v16 = vshll.u32 %v2428_v15, %v556_v63  ;;  %v571_v18 = vshll.u32 %v2429_v17, %v556_v63  ;;  %vm574_vm2 = vcmp.lt.s32.totalorder %v555_v62, 1  ;;  %vm575_vm3 = vcmp.lt.s32.totalorder %v555_v62, 2 }
  0xae   : > { %v560_v19 = vshrl.u32 %v2426_v11, %v557_v6  ;;  %v563_v20 = vshrl.u32 %v2427_v13, %v557_v6  ;;  %v566_v21 = vshrl.u32 %v2428_v15, %v557_v6  ;;  %v558_v22 = vshrl.u32 %v2425_v7, %v557_v6 }
  0xaf   : > { %v569_v23 = vshrl.u32 %v2429_v17, %v557_v6  ;;  %v572_v25 = vshrl.u32 %v2430_v24, %v557_v6  ;;  %v349_v29 = vsub.s32 32, %v348_v9  ;;  %vm576_vm4 = vcmp.lt.s32.totalorder %v555_v62, 3 }
  0xb0   : > { %v561_v26 = vor.u32 %v560_v19, %v559_v8  ;;  %v564_v27 = vor.u32 %v563_v20, %v562_v12  ;;  %v567_v28 = vor.u32 %v566_v21, %v565_v14  ;;  %vm577_vm5 = vcmp.lt.s32.totalorder %v555_v62, 4 }
  0xb1   : > { %v570_v30 = vor.u32 %v569_v23, %v568_v16  ;;  %v573_v31 = vor.u32 %v572_v25, %v571_v18  ;;  %v351_v45 = vshll.u32 %v2425_v7, %v348_v9  ;;  %v352_v48 = vshrl.u32 %v2426_v11, %v349_v29 }
  0xb2   : > { %v578_v32 = vsel %vm574_vm2, %v558_v22, %v561_v26  ;;  %v579_v35 = vsel %vm577_vm5, %v567_v28, 2102212464  ;;  %v582_v36 = vsel %vm574_vm2, %v561_v26, %v564_v27  ;;  %v586_v37 = vsel %vm574_vm2, %v564_v27, %v567_v28 }
  0xb3   : > { %v580_v38 = vsel %vm576_vm4, %v564_v27, %v579_v35  ;;  %v583_v41 = vsel %vm577_vm5, %v570_v30, 920167782  ;;  %v587_v43 = vsel %vm577_vm5, %v573_v31, 1326507024  ;;  %v354_v49 = vshll.u32 %v2426_v11, %v348_v9 }
  0xb4   : > { %v584_v46 = vsel %vm576_vm4, %v567_v28, %v583_v41  ;;  %v588_v47 = vsel %vm576_vm4, %v570_v30, %v587_v43  ;;  %v581_v50 = vsel %vm575_vm3, %v578_v32, %v580_v38  ;;  %v355_v54 = vshrl.u32 %v2427_v13, %v349_v29 }
  0xb5   : > { %v585_v51 = vsel %vm575_vm3, %v582_v36, %v584_v46  ;;  %v589_v53 = vsel %vm575_vm3, %v586_v37, %v588_v47  ;;  %v353_v59 = vor.u32 %v352_v48, %v351_v45  ;;  %v357_v61 = vshll.u32 %v2427_v13, %v348_v9 }
  0xb6   : > { %v2594_v55 = vmul.u32.u64.low %v2563_v2, %v589_v53  ;;  %v2595_v56 = vmul.u32.u64.high %v2563_v2, %v589_v53, %v2594_v55  ;;  %v2598_v57 = vmul.u32.u64.low %v2563_v2, %v585_v51  ;;  %v2599_v58 = vmul.u32.u64.high %v2563_v2, %v585_v51, %v2598_v57 }
  0xb7   : > { %v356_v60 = vor.u32 %v355_v54, %v354_v49  ;;  %v358_v63 = vshrl.u32 %v2428_v15, %v349_v29  ;;  %v350_v0 = vshrl.u32 %v2425_v7, %v349_v29  ;;  %v360_v62 = vshll.u32 %v2428_v15, %v348_v9 }
  0xb8   : > { %v361_v6 = vshrl.u32 %v2429_v17, %v349_v29  ;;  %v364_v8 = vshrl.u32 %v2430_v24, %v349_v29  ;;  %v597_v12 = vmul.u32 %v2563_v2, %v581_v50  ;;  %v363_v16 = vshll.u32 %v2429_v17, %v348_v9 }
  0xb9   : > { %v359_v14 = vor.u32 %v358_v63, %v357_v61  ;;  %vm366_vm6 = vcmp.lt.s32.totalorder %v2565_v3, 1  ;;  %vm599_vm7 = vc.u32 %v2595_v56, %v2598_v57  ;;  %v600_v18 = vadd.s32 1, %v2599_v58 }
  0xba   : > { %v362_v19 = vor.u32 %v361_v6, %v360_v62  ;;  %vm367_vm8 = vcmp.lt.s32.totalorder %v2565_v3, 2  ;;  %v365_v20 = vor.u32 %v364_v8, %v363_v16  ;;  %vm368_vm9 = vcmp.lt.s32.totalorder %v2565_v3, 3 }
  0xbb   : > { %vm369_vm10 = vcmp.lt.s32.totalorder %v2565_v3, 4  ;;  %v374_v21 = vsel %vm366_vm6, %v353_v59, %v356_v60  ;;  %v601_v2 = vsel %vm599_vm7, %v600_v18, %v2599_v58  ;;  %v378_v9 = vsel %vm366_vm6, %v356_v60, %v359_v14  ;;  %v237_v58 = vpop.permute.xlu1 %236 }
  0xbc   : > { %v371_v22 = vsel %vm369_vm10, %v359_v14, 2102212464  ;;  %v375_v23 = vsel %vm369_vm10, %v362_v19, 920167782  ;;  %v602_v25 = vadd.s32 %v601_v2, %v597_v12  ;;  %v370_v26 = vsel %vm366_vm6, %v350_v0, %v353_v59 }
  0xbd   : > { %v376_v27 = vsel %vm368_vm9, %v359_v14, %v375_v23  ;;  %v379_v28 = vsel %vm369_vm10, %v365_v20, 1326507024  ;;  %v372_v29 = vsel %vm368_vm9, %v356_v60, %v371_v22  ;;  %v656_v32 = vadd.s32 1, %v2571_v10 }
  0xbe   : > { %v377_v30 = vsel %vm367_vm8, %v374_v21, %v376_v27  ;;  %v380_v31 = vsel %vm368_vm9, %v362_v19, %v379_v28  ;;  %v603_v35 = vadd.s32 536870912, %v602_v25  ;;  %v653_v45 = vand.u32 8388607, %v646_v5 }
  0xbf   : > { %v381_v36 = vsel %vm367_vm8, %v378_v9, %v380_v31  ;;  %v2622_v37 = vmul.u32.u64.low %v2567_v4, %v377_v30  ;;  %v2623_v38 = vmul.u32.u64.high %v2567_v4, %v377_v30, %v2622_v37  ;;  %vm657_vm11 = vcmp.gt.s32.totalorder %v656_v32, 0 }
  0xc0   : > { %v2627_v41 = vmul.u32.u64.low %v2567_v4, %v381_v36  ;;  %v2628_v43 = vmul.u32.u64.high %v2567_v4, %v381_v36, %v2627_v41  ;;  %v604_v46 = vshrl.u32 %v603_v35, 30  ;;  %v373_v10 = vsel %vm367_vm8, %v370_v26, %v372_v29 }
  0xc1   : > { %v658_v47 = vsel %vm657_vm11, %v656_v32, 0  ;;  %v392_v50 = vadd.s32 1, %v2623_v38  ;;  %v2637_v51 = vadd.f32 %v2537_v34, %v2561_v1  ;;  %v389_v53 = vmul.u32 %v2567_v4, %v373_v10 }
  0xc2   : > { %v660_v48 = vand.u32 31, %v658_v47  ;;  %v605_v49 = vshll.u32 %v604_v46, 30  ;;  %vm391_vm12 = vc.u32 %v2628_v43, %v2622_v37  ;;  %v654_v54 = vor.u32 8388608, %v653_v45 }
  0xc3   : > { %v393_v3 = vsel %vm391_vm12, %v392_v50, %v2623_v38  ;;  %v598_v61 = vadd.s32 %v2598_v57, %v2595_v56  ;;  %v438_v63 = vand.u32 2147483647, %v2637_v51  ;;  %v2650_v4 = vmul.f32 %v2532_v33, %v237_v58 }
  0xc4   : > { %v661_v55 = vsub.s32 32, %v660_v48  ;;  %v2642_v59 = vsub.s32 %v602_v25, %v605_v49  ;;  %v394_v60 = vadd.s32 %v393_v3, %v389_v53  ;;  %v2653_v6 = vshll.u32 %v654_v54, 8 }
  0xc5   : > { %v441_v8 = vand.u32 2139095040, %v2637_v51  ;;  %v2657_v14 = vshrl.u32 %v658_v47, 5  ;;  %v628_v16 = vsub.s32 4, %v604_v46  ;;  %v663_v19 = vshll.u32 %v2425_v7, %v660_v48 }
  0xc6   : > { %v608_v1 = vsub.s32 0, %v2642_v59  ;;  %v395_v0 = vadd.s32 536870912, %v394_v60  ;;  %v664_v62 = vshrl.u32 %v2426_v11, %v661_v55  ;;  %v667_v56 = vshrl.u32 %v2427_v13, %v661_v55 }
  0xc7   : > { %v670_v57 = vshrl.u32 %v2428_v15, %v661_v55  ;;  %v673_v20 = vshrl.u32 %v2429_v17, %v661_v55  ;;  %v666_v2 = vshll.u32 %v2426_v11, %v660_v48  ;;  %v669_v22 = vshll.u32 %v2427_v13, %v660_v48 }
  0xc8   : > { %v2114_v12 = vmin.u32 %v608_v1, %v2642_v59  ;;  %v396_v18 = vshrl.u32 %v395_v0, 30  ;;  %v676_v23 = vshrl.u32 %v2430_v24, %v661_v55  ;;  %v665_v25 = vor.u32 %v664_v62, %v663_v19 }
  0xc9   : > { %v672_v26 = vshll.u32 %v2428_v15, %v660_v48  ;;  %v442_v27 = vshrl.u32 %v441_v8, 23  ;;  %v668_v29 = vor.u32 %v667_v56, %v666_v2  ;;  %v671_v30 = vor.u32 %v670_v57, %v669_v22 }
  0xca   : > { %v610_v21 = vclz %v2114_v12  ;;  %v397_v9 = vshll.u32 %v396_v18, 30  ;;  %v675_v31 = vshll.u32 %v2429_v17, %v660_v48  ;;  %v2670_v32 = vsel %vm544_vm13, %v628_v16, %v604_v46 }
  0xcb   : > { %v662_v36 = vshrl.u32 %v2425_v7, %v661_v55  ;;  %v674_v38 = vor.u32 %v673_v20, %v672_v26  ;;  %v420_v41 = vsub.s32 4, %v396_v18  ;;  %vm678_vm0 = vcmp.lt.s32.totalorder %v2657_v14, 1 }
  0xcc   : > { %v2115_v28 = vadd.s32 4294967294, %v610_v21  ;;  %v2673_v35 = vsub.s32 %v394_v60, %v397_v9  ;;  %v677_v45 = vor.u32 %v676_v23, %v675_v31  ;;  %vm680_vm2 = vcmp.lt.s32.totalorder %v2657_v14, 3 }
  0xcd   : > { %vm681_vm3 = vcmp.lt.s32.totalorder %v2657_v14, 4  ;;  %vm2688_vm4 = vcmp.le.f32.partialorder %v334_v44, 0.7853982  ;;  %v686_v42 = vsel %vm678_vm0, %v665_v25, %v668_v29  ;;  %v690_v3 = vsel %vm678_vm0, %v668_v29, %v671_v30 }
  0xce   : > { %vm2116_vm15 = vcmp.lt.s32.totalorder %v2115_v28, 0  ;;  %v400_v47 = vsub.s32 0, %v2673_v35  ;;  %v683_v53 = vsel %vm681_vm3, %v671_v30, 2102212464  ;;  %v687_v58 = vsel %vm681_vm3, %v674_v38, 920167782 }
  0xcf   : > { %v613_v46 = vsel %vm2116_vm15, 0, %v2115_v28  ;;  %v688_v44 = vsel %vm680_vm2, %v671_v30, %v687_v58  ;;  %v691_v0 = vsel %vm681_vm3, %v677_v45, 1326507024  ;;  %vm679_vm5 = vcmp.lt.s32.totalorder %v2657_v14, 2 }
  0xd0   : > { %v614_v48 = vsub.s32 32, %v613_v46  ;;  %v618_v49 = vsub.s32 4294967266, %v613_v46  ;;  %v615_v54 = vshll.u32 %v2642_v59, %v613_v46  ;;  %v2106_v55 = vmin.u32 %v400_v47, %v2673_v35 }
  0xd1   : > { %v682_v8 = vsel %vm678_vm0, %v662_v36, %v665_v25  ;;  %v684_v59 = vsel %vm680_vm2, %v668_v29, %v683_v53  ;;  %v689_v57 = vsel %vm679_vm5, %v686_v42, %v688_v44  ;;  %v421_v22 = vsel %vm336_vm14, %v420_v41, %v396_v18  ;;  %v232_v42 = vpop.permute.xlu0 %231 }
  0xd2   : > { %v616_v60 = vshrl.u32 %v598_v61, %v614_v48  ;;  %v619_v1 = vadd.s32 127, %v618_v49  ;;  %v402_v62 = vclz %v2106_v55  ;;  %v692_v61 = vsel %vm680_vm2, %v674_v38, %v691_v0 }
  0xd3   : > { %v693_v19 = vsel %vm679_vm5, %v690_v3, %v692_v61  ;;  %v2708_v20 = vmul.u32.u64.low %v2653_v6, %v689_v57  ;;  %v2709_v21 = vmul.u32.u64.high %v2653_v6, %v689_v57, %v2708_v20  ;;  %v390_v25 = vadd.s32 %v2622_v37, %v2628_v43 }
  0xd4   : > { %v617_v12 = vor.u32 %v616_v60, %v615_v54  ;;  %v620_v56 = vshll.u32 %v619_v1, 23  ;;  %v2107_v16 = vadd.s32 4294967294, %v402_v62  ;;  %v685_v14 = vsel %vm679_vm5, %v682_v8, %v684_v59 }
  0xd5   : > { %v2714_v23 = vmul.u32.u64.low %v2653_v6, %v693_v19  ;;  %v2715_v9 = vmul.u32.u64.high %v2653_v6, %v693_v19, %v2714_v23  ;;  %v2109_v26 = vadd.s32 4294967169, %v442_v27  ;;  %v631_v30 = vsel %vm2679_vm1, 0, %v2670_v32 }
  0xd6   : > { %v621_v2 = vor.u32 4788187, %v620_v56  ;;  %vm2108_vm6 = vcmp.lt.s32.totalorder %v2107_v16, 0  ;;  %v624_v29 = vcvt.s32.f32 %v617_v12  ;;  %v423_v18 = vsel %vm2688_vm4, 0, %v421_v22 }
  0xd7   : > { %v405_v31 = vsel %vm2108_vm6, 0, %v2107_v16  ;;  %v704_v41 = vadd.s32 1, %v2709_v21  ;;  %v701_v37 = vmul.u32 %v2653_v6, %v685_v14  ;;  %vm703_vm7 = vc.u32 %v2715_v9, %v2708_v20 }
  0xd8   : > { %v622_v28 = vand.u32 2147483647, %v621_v2  ;;  %v406_v36 = vsub.s32 32, %v405_v31  ;;  %v410_v38 = vsub.s32 4294967266, %v405_v31  ;;  %v448_v43 = vadd.s32 1, %v2109_v26 }
  0xd9   : > { %v407_v27 = vshll.u32 %v2673_v35, %v405_v31  ;;  %v705_v32 = vsel %vm703_vm7, %v704_v41, %v2709_v21  ;;  %v635_v49 = vadd.s32 3, %v631_v30  ;;  %v427_v58 = vadd.s32 3, %v423_v18 }
  0xda   : > { %v625_v45 = vmul.f32 %v624_v29, %v622_v28  ;;  %v408_v46 = vshrl.u32 %v390_v25, %v406_v36  ;;  %v411_v47 = vadd.s32 127, %v410_v38  ;;  %v706_v53 = vadd.s32 %v705_v32, %v701_v37 }
  0xdb   : > { %vm449_vm8 = vcmp.gt.s32.totalorder %v448_v43, 0  ;;  %v445_v35 = vand.u32 8388607, %v438_v63  ;;  %v2737_v62 = vmul.f32 %v2532_v33, %v232_v42  ;;  %v2739_v8 = vand.u32 3, %v635_v49 }
  0xdc   : > { %v626_v48 = vxor.u32 2147483648, %v625_v45  ;;  %v409_v54 = vor.u32 %v408_v46, %v407_v27  ;;  %v412_v55 = vshll.u32 %v411_v47, 23  ;;  %v450_v3 = vsel %vm449_vm8, %v448_v43, 0 }
  0xdd   : > { %v707_v60 = vadd.s32 536870912, %v706_v53  ;;  %v452_v1 = vand.u32 31, %v450_v3  ;;  %vm648_vm9 = vcmp.lt.s32.totalorder %v2557_v52, 0  ;;  %v2742_v61 = vand.u32 3, %v427_v58 }
  0xde   : > { %v627_v6 = vsel %vm544_vm13, %v626_v48, %v625_v45  ;;  %v413_v0 = vor.u32 4788187, %v412_v55  ;;  %v416_v57 = vcvt.s32.f32 %v409_v54  ;;  %v446_v19 = vor.u32 8388608, %v445_v35 }
  0xdf   : > { %v630_v44 = vsel %vm2679_vm1, %v2542_v39, %v627_v6  ;;  %v708_v59 = vshrl.u32 %v707_v60, 30  ;;  %v453_v12 = vsub.s32 32, %v452_v1  ;;  %v2747_v21 = vadd.f32 %v2537_v34, %v2650_v4 }
  0xe0   : > { %2292 = vcosq.f32 %v630_v44  ;;  %v414_v56 = vand.u32 2147483647, %v413_v0  ;;  %v2750_v22 = vadd.s32 %v2708_v20, %v2715_v9  ;;  %vm641_vm10 = vcmp.eq.s32.totalorder %v2739_v8, 2 }
  0xe1   : > { %2294 = vsinq.f32 %v630_v44  ;;  %v709_v16 = vshll.u32 %v708_v59, 30  ;;  %v456_v10 = vshrl.u32 %v2426_v11, %v453_v12  ;;  %v459_v23 = vshrl.u32 %v2427_v13, %v453_v12 }
  0xe2   : > { %v417_v2 = vmul.f32 %v416_v57, %v414_v56  ;;  %v462_v25 = vshrl.u32 %v2428_v15, %v453_v12  ;;  %v2757_v26 = vshrl.u32 %v450_v3, 5  ;;  %v455_v28 = vshll.u32 %v2425_v7, %v452_v1 }
  0xe3   : > { %v2755_v14 = vsub.s32 %v706_v53, %v709_v16  ;;  %v465_v29 = vshrl.u32 %v2429_v17, %v453_v12  ;;  %vm638_vm11 = vcmp.eq.s32.totalorder %v2739_v8, 0  ;;  %v732_v30 = vsub.s32 4, %v708_v59 }
  0xe4   : > { %v418_v4 = vxor.u32 2147483648, %v417_v2  ;;  %v458_v20 = vshll.u32 %v2426_v11, %v452_v1  ;;  %v461_v9 = vshll.u32 %v2427_v13, %v452_v1  ;;  %vm637_vm12 = vcmp.lt.s32.totalorder %v2739_v8, 2 }
  0xe5   : > { %v712_v31 = vsub.s32 0, %v2755_v14  ;;  %v457_v36 = vor.u32 %v456_v10, %v455_v28  ;;  %v464_v38 = vshll.u32 %v2428_v15, %v452_v1  ;;  %v2767_v18 = vshll.u32 %v446_v19, 8 }
  0xe6   : > { %vm634_vm13 = vweird.f32 %v2542_v39  ;;  %v419_v41 = vsel %vm336_vm14, %v418_v4, %v417_v2  ;;  %v460_v45 = vor.u32 %v459_v23, %v458_v20  ;;  %v463_v37 = vor.u32 %v462_v25, %v461_v9 }
  0xe7   : > { %v468_v43 = vshrl.u32 %v2430_v24, %v453_v12  ;;  %v422_v27 = vsel %vm2688_vm4, %v2545_v40, %v419_v41  ;;  %v2118_v46 = vmin.u32 %v712_v31, %v2755_v14  ;;  %v466_v47 = vor.u32 %v465_v29, %v464_v38 }
  0xe8   : > { %v467_v32 = vshll.u32 %v2429_v17, %v452_v1  ;;  %2296 = vcosq.f32 %v422_v27  ;;  %v2780_v48 = vsel %vm648_vm9, %v732_v30, %v708_v59  ;;  %v454_v49 = vshrl.u32 %v2425_v7, %v453_v12 }
  0xe9   : > { %vm470_vm14 = vcmp.lt.s32.totalorder %v2757_v26, 1  ;;  %2298 = vsinq.f32 %v422_v27  ;;  %vm2786_vm15 = vcmp.le.f32.partialorder %v646_v5, 0.7853982  ;;  %v714_v42 = vclz %v2118_v46 }
  0xea   : > { %v2293_v53 = vpop.eup %2292  ;;  %v469_v54 = vor.u32 %v468_v43, %v467_v32  ;;  %vm471_vm0 = vcmp.lt.s32.totalorder %v2757_v26, 2  ;;  %vm472_vm1 = vcmp.lt.s32.totalorder %v2757_v26, 3  ;;  %vm473_vm2 = vcmp.lt.s32.totalorder %v2757_v26, 4 }
  0xeb   : > { %v2295_v55 = vpop.eup %2294  ;;  %v642_v58 = vxor.u32 2147483648, %v2293_v53  ;;  %v478_v3 = vsel %vm470_vm14, %v457_v36, %v460_v45  ;;  %v2119_v5 = vadd.s32 4294967294, %v714_v42  ;;  %v475_v60 = vsel %vm473_vm2, %v463_v37, 2102212464 }
  0xec   : > { %v639_v6 = vxor.u32 2147483648, %v2295_v55  ;;  %v479_v35 = vsel %vm473_vm2, %v466_v47, 920167782  ;;  %v474_v44 = vsel %vm470_vm14, %v454_v49, %v457_v36  ;;  %v482_v59 = vsel %vm470_vm14, %v460_v45, %v463_v37 }
  0xed   : > { %v643_v1 = vsel %vm641_vm10, %v642_v58, %v2295_v55  ;;  %v480_v0 = vsel %vm472_vm1, %v463_v37, %v479_v35  ;;  %vm2120_vm3 = vcmp.lt.s32.totalorder %v2119_v5, 0  ;;  %v483_v57 = vsel %vm473_vm2, %v469_v54, 1326507024 }
  0xee   : > { %v640_v12 = vsel %vm638_vm11, %v2293_v53, %v639_v6  ;;  %v481_v56 = vsel %vm471_vm0, %v478_v3, %v480_v0  ;;  %v717_v19 = vsel %vm2120_vm3, 0, %v2119_v5  ;;  %v476_v10 = vsel %vm472_vm1, %v460_v45, %v475_v60 }
  0xef   : > { %v644_v16 = vsel %vm637_vm12, %v640_v12, %v643_v1  ;;  %v484_v2 = vsel %vm472_vm1, %v466_v47, %v483_v57  ;;  %vm426_vm4 = vweird.f32 %v2545_v40  ;;  %v718_v25 = vsub.s32 32, %v717_v19 }
  0xf0   : > { %v645_v23 = vsel %vm634_vm13, nan, %v644_v16  ;;  %v719_v28 = vshll.u32 %v2755_v14, %v717_v19  ;;  %v722_v29 = vsub.s32 4294967266, %v717_v19  ;;  %v485_v8 = vsel %vm471_vm0, %v482_v59, %v484_v2 }
  0xf1   : > { %2000 = vst [vmem:[%s2819_s9 + $0x10] sm:$0xff] %v645_v23  ;;  %v2825_v4 = vmul.u32.u64.low %v2767_v18, %v481_v56  ;;  %v2826_v30 = vmul.u32.u64.high %v2767_v18, %v481_v56, %v2825_v4  ;;  %v857_v39 = vand.u32 2139095040, %v2747_v21  ;;  %v720_v20 = vshrl.u32 %v2750_v22, %v718_v25 }
  0xf2   : > { %v723_v9 = vadd.s32 127, %v722_v29  ;;  %v2832_v14 = vmul.u32.u64.low %v2767_v18, %v485_v8  ;;  %v2833_v31 = vmul.u32.u64.high %v2767_v18, %v485_v8, %v2832_v14  ;;  %v2297_v36 = vpop.eup %2296  ;;  %vm429_vm5 = vcmp.lt.s32.totalorder %v2742_v61, 2 }
  0xf3   : > { %vm433_vm6 = vcmp.eq.s32.totalorder %v2742_v61, 2  ;;  %v735_v38 = vsel %vm2786_vm15, 0, %v2780_v48  ;;  %v858_v41 = vshrl.u32 %v857_v39, 23  ;;  %v2299_v45 = vpop.eup %2298  ;;  %v434_v37 = vxor.u32 2147483648, %v2297_v36 }
  0xf4   : > { %v721_v43 = vor.u32 %v720_v20, %v719_v28  ;;  %v724_v27 = vshll.u32 %v723_v9, 23  ;;  %v477_v22 = vsel %vm471_vm0, %v474_v44, %v476_v10  ;;  %v431_v46 = vxor.u32 2147483648, %v2299_v45 }
  0xf5   : > { %v496_v47 = vadd.s32 1, %v2826_v30  ;;  %v854_v32 = vand.u32 2147483647, %v2747_v21  ;;  %v2125_v49 = vadd.s32 4294967169, %v858_v41  ;;  %vm430_vm7 = vcmp.eq.s32.totalorder %v2742_v61, 0 }
  0xf6   : > { %v435_v53 = vsel %vm433_vm6, %v434_v37, %v2299_v45  ;;  %v725_v42 = vor.u32 4788187, %v724_v27  ;;  %v739_v48 = vadd.s32 3, %v735_v38  ;;  %v432_v54 = vsel %vm430_vm7, %v2297_v36, %v431_v46 }
  0xf7   : > { %v493_v55 = vmul.u32 %v2767_v18, %v477_v22  ;;  %vm495_vm8 = vc.u32 %v2833_v31, %v2825_v4  ;;  %v864_v26 = vadd.s32 1, %v2125_v49  ;;  %v436_v58 = vsel %vm429_vm5, %v432_v54, %v435_v53 }
  0xf8   : > { %v726_v3 = vand.u32 2147483647, %v725_v42  ;;  %v728_v6 = vcvt.s32.f32 %v721_v43  ;;  %v497_v5 = vsel %vm495_vm8, %v496_v47, %v2826_v30  ;;  %v437_v60 = vsel %vm426_vm4, nan, %v436_v58 }
  0xf9   : > { %v498_v35 = vadd.s32 %v497_v5, %v493_v55  ;;  %v861_v1 = vand.u32 8388607, %v854_v32  ;;  %vm865_vm10 = vcmp.gt.s32.totalorder %v864_v26, 0  ;;  %1998 = vst [vmem:[%s2819_s9] sm:$0xff] %v437_v60  ;;  %v2858_v0 = vadd.f32 %v2537_v34, %v2737_v62 }
  0xfa   : > { %v729_v18 = vmul.f32 %v728_v6, %v726_v3  ;;  %v866_v44 = vsel %vm865_vm10, %v864_v26, 0  ;;  %v2860_v56 = vand.u32 3, %v739_v48  ;;  %v494_v27 = vadd.s32 %v2825_v4, %v2833_v31 }
  0xfb   : > { %v499_v61 = vadd.s32 536870912, %v498_v35  ;;  %v868_v59 = vand.u32 31, %v866_v44  ;;  %v862_v40 = vor.u32 8388608, %v861_v1  ;;  %v2866_v10 = vshrl.u32 %v866_v44, 5 }
  0xfc   : > { %v730_v12 = vxor.u32 2147483648, %v729_v18  ;;  %v753_v23 = vand.u32 2139095040, %v2858_v0  ;;  %v750_v46 = vand.u32 2147483647, %v2858_v0  ;;  %vm742_vm11 = vcmp.eq.s32.totalorder %v2860_v56, 0 }
  0xfd   : > { %v2862_v57 = vshrl.u32 %v499_v61, 30  ;;  %v869_v16 = vsub.s32 32, %v868_v59  ;;  %v871_v2 = vshll.u32 %v2425_v7, %v868_v59  ;;  %v874_v28 = vshll.u32 %v2426_v11, %v868_v59 }
  0xfe   : > { %v731_v19 = vsel %vm648_vm9, %v730_v12, %v729_v18  ;;  %v877_v29 = vshll.u32 %v2427_v13, %v868_v59  ;;  %v880_v9 = vshll.u32 %v2428_v15, %v868_v59  ;;  %v883_v38 = vshll.u32 %v2429_v17, %v868_v59 }
  0xff   : > { %v734_v62 = vsel %vm2786_vm15, %v2557_v52, %v731_v19  ;;  %v501_v25 = vshll.u32 %v2862_v57, 30  ;;  %v872_v8 = vshrl.u32 %v2426_v11, %v869_v16  ;;  %v875_v30 = vshrl.u32 %v2427_v13, %v869_v16 }
 0x100   : > { %2300 = vcosq.f32 %v734_v62  ;;  %v878_v39 = vshrl.u32 %v2428_v15, %v869_v16  ;;  %v881_v50 = vshrl.u32 %v2429_v17, %v869_v16  ;;  %v884_v43 = vshrl.u32 %v2430_v24, %v869_v16 }
 0x101   : > { %2302 = vsinq.f32 %v734_v62  ;;  %v2879_v20 = vsub.s32 %v498_v35, %v501_v25  ;;  %v873_v14 = vor.u32 %v872_v8, %v871_v2  ;;  %v876_v36 = vor.u32 %v875_v30, %v874_v28 }
 0x102   : > { %v879_v45 = vor.u32 %v878_v39, %v877_v29  ;;  %v882_v37 = vor.u32 %v881_v50, %v880_v9  ;;  %vm745_vm9 = vcmp.eq.s32.totalorder %v2860_v56, 2  ;;  %v2889_v22 = vshll.u32 %v862_v40, 8 }
 0x103   : > { %v504_v41 = vsub.s32 0, %v2879_v20  ;;  %v754_v47 = vshrl.u32 %v753_v23, 23  ;;  %vm440_vm12 = vcmp.lt.s32.totalorder %v2637_v51, 0  ;;  %v885_v53 = vor.u32 %v884_v43, %v883_v38 }
 0x104   : > { %vm886_vm13 = vcmp.lt.s32.totalorder %v2866_v10, 1  ;;  %vm889_vm14 = vcmp.lt.s32.totalorder %v2866_v10, 4  ;;  %vm741_vm15 = vcmp.lt.s32.totalorder %v2860_v56, 2  ;;  %v524_v4 = vsub.s32 4, %v2862_v57 }
 0x105   : > { %v2110_v49 = vmin.u32 %v504_v41, %v2879_v20  ;;  %v870_v31 = vshrl.u32 %v2425_v7, %v869_v16  ;;  %v894_v42 = vsel %vm886_vm13, %v873_v14, %v876_v36  ;;  %v895_v48 = vsel %vm889_vm14, %v882_v37, 920167782 }
 0x106   : > { %vm738_vm0 = vweird.f32 %v2557_v52  ;;  %vm888_vm1 = vcmp.lt.s32.totalorder %v2866_v10, 3  ;;  %v891_v55 = vsel %vm889_vm14, %v879_v45, 2102212464  ;;  %v898_v26 = vsel %vm886_vm13, %v876_v36, %v879_v45 }
 0x107   : > { %v506_v54 = vclz %v2110_v49  ;;  %vm887_vm2 = vcmp.lt.s32.totalorder %v2866_v10, 2  ;;  %v896_v58 = vsel %vm888_vm1, %v879_v45, %v895_v48  ;;  %v899_v3 = vsel %vm889_vm14, %v885_v53, 1326507024 }
 0x108   : > { %v2121_v6 = vadd.s32 4294967169, %v754_v47  ;;  %v890_v60 = vsel %vm886_vm13, %v870_v31, %v873_v14  ;;  %v897_v35 = vsel %vm887_vm2, %v894_v42, %v896_v58  ;;  %v900_v1 = vsel %vm888_vm1, %v882_v37, %v899_v3 }
 0x109   : > { %v2111_v5 = vadd.s32 4294967294, %v506_v54  ;;  %v892_v44 = vsel %vm888_vm1, %v876_v36, %v891_v55  ;;  %v901_v61 = vsel %vm887_vm2, %v898_v26, %v900_v1  ;;  %v2924_v25 = vand.u32 8388607, %v750_v46 }
 0x10a   : > { %v2301_v18 = vpop.eup %2300  ;;  %v2914_v59 = vmul.u32.u64.low %v2889_v22, %v897_v35  ;;  %v2915_v12 = vmul.u32.u64.high %v2889_v22, %v897_v35, %v2914_v59  ;;  %v2919_v19 = vmul.u32.u64.low %v2889_v22, %v901_v61  ;;  %v2920_v2 = vmul.u32.u64.high %v2889_v22, %v901_v61, %v2919_v19 }
 0x10b   : > { %v2303_v40 = vpop.eup %2302  ;;  %v746_v16 = vxor.u32 2147483648, %v2301_v18  ;;  %vm2112_vm3 = vcmp.lt.s32.totalorder %v2111_v5, 0  ;;  %v760_v28 = vadd.s32 1, %v2121_v6  ;;  %v893_v39 = vsel %vm887_vm2, %v890_v60, %v892_v44  ;;  %v242_v6 = vpop.permute.xlu0 %241 }
 0x10c   : > { %v743_v23 = vxor.u32 2147483648, %v2303_v40  ;;  %v509_v62 = vsel %vm2112_vm3, 0, %v2111_v5  ;;  %v525_v50 = vsel %vm440_vm12, %v524_v4, %v2862_v57  ;;  %v912_v14 = vadd.s32 1, %v2915_v12  ;;  %v247_v57 = vpop.permute.xlu1 %246 }
 0x10d   : > { %v747_v29 = vsel %vm745_vm9, %v746_v16, %v2303_v40  ;;  %v510_v8 = vsub.s32 32, %v509_v62  ;;  %v514_v30 = vsub.s32 4294967266, %v509_v62  ;;  %vm761_vm4 = vcmp.gt.s32.totalorder %v760_v28, 0 }
 0x10e   : > { %v744_v9 = vsel %vm742_vm11, %v2301_v18, %v743_v23  ;;  %v511_v38 = vshll.u32 %v2879_v20, %v509_v62  ;;  %v909_v37 = vmul.u32 %v2889_v22, %v893_v39  ;;  %vm911_vm5 = vc.u32 %v2920_v2, %v2914_v59 }
 0x10f   : > { %v748_v36 = vsel %vm741_vm15, %v744_v9, %v747_v29  ;;  %v512_v41 = vshrl.u32 %v494_v27, %v510_v8  ;;  %v515_v45 = vadd.s32 127, %v514_v30  ;;  %v762_v43 = vsel %vm761_vm4, %v760_v28, 0 }
 0x110   : > { %v749_v10 = vsel %vm738_vm0, nan, %v748_v36  ;;  %v913_v56 = vsel %vm911_vm5, %v912_v14, %v2915_v12  ;;  %vm2948_vm6 = vcmp.le.f32.partialorder %v438_v63, 0.7853982  ;;  %v764_v27 = vand.u32 31, %v762_v43 }
 0x111   : > { %2001 = vst [vmem:[%s2819_s9 + $0x18] sm:$0xff] %v749_v10  ;;  %v513_v47 = vor.u32 %v512_v41, %v511_v38  ;;  %v516_v49 = vshll.u32 %v515_v45, 23  ;;  %v914_v52 = vadd.s32 %v913_v56, %v909_v37  ;;  %v527_v22 = vsel %vm2948_vm6, 0, %v525_v50 }
 0x112   : > { %v758_v4 = vor.u32 8388608, %v2924_v25  ;;  %v302_v31 = vmul.f32 %v2532_v33, %v247_v57  ;;  %v763_v54 = vshrl.u32 %v762_v43, 5  ;;  %v765_v55 = vsub.s32 32, %v764_v27 }
 0x113   : > { %v517_v53 = vor.u32 4788187, %v516_v49  ;;  %v520_v42 = vcvt.s32.f32 %v513_v47  ;;  %v915_v48 = vadd.s32 536870912, %v914_v52  ;;  %v767_v63 = vshll.u32 %v2425_v7, %v764_v27 }
 0x114   : > { %v770_v58 = vshll.u32 %v2426_v11, %v764_v27  ;;  %v773_v3 = vshll.u32 %v2427_v13, %v764_v27  ;;  %v768_v60 = vshrl.u32 %v2426_v11, %v765_v55  ;;  %v771_v35 = vshrl.u32 %v2427_v13, %v765_v55 }
 0x115   : > { %v518_v26 = vand.u32 2147483647, %v517_v53  ;;  %v916_v5 = vshrl.u32 %v915_v48, 30  ;;  %v776_v1 = vshll.u32 %v2428_v15, %v764_v27  ;;  %v774_v44 = vshrl.u32 %v2428_v15, %v765_v55 }
 0x116   : > { %v777_v61 = vshrl.u32 %v2429_v17, %v765_v55  ;;  %v780_v12 = vshrl.u32 %v2430_v24, %v765_v55  ;;  %v769_v16 = vor.u32 %v768_v60, %v767_v63  ;;  %v779_v19 = vshll.u32 %v2429_v17, %v764_v27 }
 0x117   : > { %v521_v18 = vmul.f32 %v520_v42, %v518_v26  ;;  %v917_v40 = vshll.u32 %v916_v5, 30  ;;  %v2967_v23 = vmul.f32 %v2532_v33, %v242_v6  ;;  %vm856_vm7 = vcmp.lt.s32.totalorder %v2747_v21, 0 }
 0x118   : > { %v772_v25 = vor.u32 %v771_v35, %v770_v58  ;;  %v775_v28 = vor.u32 %v774_v44, %v773_v3  ;;  %v778_v29 = vor.u32 %v777_v61, %v776_v1  ;;  %v531_v8 = vadd.s32 3, %v527_v22 }
 0x119   : > { %v522_v62 = vxor.u32 2147483648, %v521_v18  ;;  %v2970_v30 = vsub.s32 %v914_v52, %v917_v40  ;;  %vm782_vm8 = vcmp.lt.s32.totalorder %v763_v54, 1  ;;  %v2973_v39 = vadd.f32 %v2537_v34, %v302_v31 }
 0x11a   : > { %v766_v50 = vshrl.u32 %v2425_v7, %v765_v55  ;;  %v781_v33 = vor.u32 %v780_v12, %v779_v19  ;;  %vm783_vm10 = vcmp.lt.s32.totalorder %v763_v54, 2  ;;  %vm784_vm9 = vcmp.lt.s32.totalorder %v763_v54, 3 }
 0x11b   : > { %v523_v9 = vsel %vm440_vm12, %v522_v62, %v521_v18  ;;  %v920_v36 = vsub.s32 0, %v2970_v30  ;;  %vm785_vm11 = vcmp.lt.s32.totalorder %v763_v54, 4  ;;  %vm2984_vm13 = vcmp.le.f32.partialorder %v854_v32, 0.7853982 }
 0x11c   : > { %v526_v14 = vsel %vm2948_vm6, %v2637_v51, %v523_v9  ;;  %v787_v38 = vsel %vm785_vm11, %v775_v28, 2102212464  ;;  %v790_v41 = vsel %vm782_vm8, %v769_v16, %v772_v25  ;;  %v791_v45 = vsel %vm785_vm11, %v778_v29, 920167782 }
 0x11d   : > { %2304 = vcosq.f32 %v526_v14  ;;  %v2126_v10 = vmin.u32 %v920_v36, %v2970_v30  ;;  %v940_v37 = vsub.s32 4, %v916_v5  ;;  %v792_v43 = vsel %vm784_vm9, %v775_v28, %v791_v45 }
 0x11e   : > { %2306 = vsinq.f32 %v526_v14  ;;  %v793_v57 = vsel %vm783_vm10, %v790_v41, %v792_v43  ;;  %v794_v47 = vsel %vm782_vm8, %v772_v25, %v775_v28  ;;  %v795_v49 = vsel %vm785_vm11, %v781_v33, 1326507024 }
 0x11f   : > { %v798_v56 = vshll.u32 %v758_v4, 8  ;;  %v532_v32 = vand.u32 3, %v531_v8  ;;  %v922_v20 = vclz %v2126_v10  ;;  %v786_v52 = vsel %vm782_vm8, %v766_v50, %v769_v16 }
 0x120   : > { %v788_v27 = vsel %vm784_vm9, %v772_v25, %v787_v38  ;;  %v796_v53 = vsel %vm784_vm9, %v778_v29, %v795_v49  ;;  %v1065_v42 = vand.u32 2139095040, %v2973_v39  ;;  %v941_v55 = vsel %vm856_vm7, %v940_v37, %v916_v5 }
 0x121   : > { %v2996_v22 = vmul.u32.u64.low %v798_v56, %v793_v57  ;;  %v2997_v31 = vmul.u32.u64.high %v798_v56, %v793_v57, %v2996_v22  ;;  %v2127_v48 = vadd.s32 4294967294, %v922_v20  ;;  %v797_v4 = vsel %vm783_vm10, %v794_v47, %v796_v53 }
 0x122   : > { %v1062_v26 = vand.u32 2147483647, %v2973_v39  ;;  %v789_v63 = vsel %vm783_vm10, %v786_v52, %v788_v27  ;;  %v3006_v58 = vmul.u32.u64.low %v798_v56, %v797_v4  ;;  %v3007_v3 = vmul.u32.u64.high %v798_v56, %v797_v4, %v3006_v58  ;;  %v3030_v52 = vld [vmem:[%s3848_s1] ss:$0 sm:$0xff] }
 0x123   : > { %v1066_v6 = vshrl.u32 %v1065_v42, 23  ;;  %vm533_vm12 = vcmp.lt.s32.totalorder %v532_v32, 2  ;;  %vm534_vm14 = vcmp.eq.s32.totalorder %v532_v32, 0  ;;  %vm537_vm15 = vcmp.eq.s32.totalorder %v532_v32, 2 }
 0x124   : > { %vm2128_vm0 = vcmp.lt.s32.totalorder %v2127_v48, 0  ;;  %v910_v60 = vadd.s32 %v2914_v59, %v2920_v2  ;;  %v808_v5 = vadd.s32 1, %v2997_v31  ;;  %v943_v54 = vsel %vm2984_vm13, 0, %v941_v55 }
 0x125   : > { %v925_v35 = vsel %vm2128_vm0, 0, %v2127_v48  ;;  %v2133_v1 = vadd.s32 4294967169, %v1066_v6  ;;  %v805_v61 = vmul.u32 %v798_v56, %v789_v63  ;;  %vm807_vm1 = vc.u32 %v3007_v3, %v2996_v22 }
 0x126   : > { %v926_v18 = vsub.s32 32, %v925_v35  ;;  %v930_v44 = vsub.s32 4294967266, %v925_v35  ;;  %v927_v40 = vshll.u32 %v2970_v30, %v925_v35  ;;  %v1069_v16 = vand.u32 8388607, %v1062_v26 }
 0x127   : > { %v2305_v12 = vpop.eup %2304  ;;  %v1072_v59 = vadd.s32 1, %v2133_v1  ;;  %v809_v28 = vsel %vm807_vm1, %v808_v5, %v2997_v31  ;;  %v947_v8 = vadd.s32 3, %v943_v54  ;;  %vm530_vm3 = vweird.f32 %v2637_v51 }
 0x128   : > { %v2307_v2 = vpop.eup %2306  ;;  %v538_v19 = vxor.u32 2147483648, %v2305_v12  ;;  %v928_v62 = vshrl.u32 %v910_v60, %v926_v18  ;;  %v931_v25 = vadd.s32 127, %v930_v44  ;;  %v810_v9 = vadd.s32 %v809_v28, %v805_v61 }
 0x129   : > { %v535_v29 = vxor.u32 2147483648, %v2307_v2  ;;  %vm1073_vm2 = vcmp.gt.s32.totalorder %v1072_v59, 0  ;;  %v1070_v41 = vor.u32 8388608, %v1069_v16  ;;  %v3025_v20 = vand.u32 3, %v947_v8 }
 0x12a   : > { %v539_v30 = vsel %vm537_vm15, %v538_v19, %v2307_v2  ;;  %v929_v50 = vor.u32 %v928_v62, %v927_v40  ;;  %v932_v33 = vshll.u32 %v931_v25, 23  ;;  %v1074_v14 = vsel %vm1073_vm2, %v1072_v59, 0 }
 0x12b   : > { %v536_v36 = vsel %vm534_vm14, %v2305_v12, %v535_v29  ;;  %v811_v38 = vadd.s32 536870912, %v810_v9  ;;  %v1076_v45 = vand.u32 31, %v1074_v14  ;;  %v3034_v27 = vadd.f32 %v3030_v52, %v2967_v23 }
 0x12c   : > { %v540_v10 = vsel %vm533_vm12, %v536_v36, %v539_v30  ;;  %v933_v37 = vor.u32 4788187, %v932_v33  ;;  %v936_v56 = vcvt.s32.f32 %v929_v50  ;;  %v3038_v31 = vshll.u32 %v1070_v41, 8 }
 0x12d   : > { %v541_v43 = vsel %vm530_vm3, nan, %v540_v10  ;;  %v812_v57 = vshrl.u32 %v811_v38, 30  ;;  %v1077_v47 = vsub.s32 32, %v1076_v45  ;;  %v1079_v32 = vshll.u32 %v2425_v7, %v1076_v45 }
 0x12e   : > { %1999 = vst [vmem:[%s2819_s9 + $0x8] sm:$0xff] %v541_v43  ;;  %v934_v49 = vand.u32 2147483647, %v933_v37  ;;  %v806_v63 = vadd.s32 %v2996_v22, %v3007_v3  ;;  %v1075_v23 = vshrl.u32 %v1074_v14, 5  ;;  %v1082_v6 = vshll.u32 %v2426_v11, %v1076_v45 }
 0x12f   : > { %v813_v51 = vshll.u32 %v812_v57, 30  ;;  %v1080_v53 = vshrl.u32 %v2426_v11, %v1077_v47  ;;  %v1083_v48 = vshrl.u32 %v2427_v13, %v1077_v47  ;;  %v1086_v55 = vshrl.u32 %v2428_v15, %v1077_v47 }
 0x130   : > { %v937_v42 = vmul.f32 %v936_v56, %v934_v49  ;;  %v1089_v4 = vshrl.u32 %v2429_v17, %v1077_v47  ;;  %v1085_v5 = vshll.u32 %v2427_v13, %v1076_v45  ;;  %v1088_v1 = vshll.u32 %v2428_v15, %v1076_v45 }
 0x131   : > { %v3045_v58 = vsub.s32 %v810_v9, %v813_v51  ;;  %v1081_v35 = vor.u32 %v1080_v53, %v1079_v32  ;;  %vm752_vm4 = vcmp.lt.s32.totalorder %v2858_v0, 0  ;;  %v1084_v44 = vor.u32 %v1083_v48, %v1082_v6 }
 0x132   : > { %v938_v60 = vxor.u32 2147483648, %v937_v42  ;;  %v1091_v54 = vshll.u32 %v2429_v17, %v1076_v45  ;;  %v1092_v22 = vshrl.u32 %v2430_v24, %v1077_v47  ;;  %v1087_v61 = vor.u32 %v1086_v55, %v1085_v5 }
 0x133   : > { %v816_v18 = vsub.s32 0, %v3045_v58  ;;  %v1090_v12 = vor.u32 %v1089_v4, %v1088_v1  ;;  %v961_v40 = vand.u32 2139095040, %v3034_v27  ;;  %v836_v2 = vsub.s32 4, %v812_v57 }
 0x134   : > { %v939_v3 = vsel %vm856_vm7, %v938_v60, %v937_v42  ;;  %v1093_v19 = vor.u32 %v1092_v22, %v1091_v54  ;;  %v1078_v62 = vshrl.u32 %v2425_v7, %v1077_v47  ;;  %vm1094_vm5 = vcmp.lt.s32.totalorder %v1075_v23, 1 }
 0x135   : > { %v942_v16 = vsel %vm2984_vm13, %v2747_v21, %v939_v3  ;;  %v2122_v59 = vmin.u32 %v816_v18, %v3045_v58  ;;  %vm1095_vm6 = vcmp.lt.s32.totalorder %v1075_v23, 2  ;;  %vm1097_vm7 = vcmp.lt.s32.totalorder %v1075_v23, 4 }
 0x136   : > { %2308 = vcosq.f32 %v942_v16  ;;  %v1102_v28 = vsel %vm1094_vm5, %v1081_v35, %v1084_v44  ;;  %vm1096_vm8 = vcmp.lt.s32.totalorder %v1075_v23, 3  ;;  %v1099_v29 = vsel %vm1097_vm7, %v1087_v61, 2102212464 }
 0x137   : > { %2310 = vsinq.f32 %v942_v16  ;;  %v818_v25 = vclz %v2122_v59  ;;  %v1103_v8 = vsel %vm1097_vm7, %v1090_v12, 920167782  ;;  %v1106_v9 = vsel %vm1094_vm5, %v1084_v44, %v1087_v61 }
 0x138   : > { %v1098_v34 = vsel %vm1094_vm5, %v1078_v62, %v1081_v35  ;;  %v1104_v50 = vsel %vm1096_vm8, %v1087_v61, %v1103_v8  ;;  %v1107_v33 = vsel %vm1097_vm7, %v1093_v19, 1326507024  ;;  %v1100_v14 = vsel %vm1096_vm8, %v1084_v44, %v1099_v29  ;;  %v257_v44 = vpop.permute.xlu1 %256  ;;  %v3099_v19 = vld [vmem:[%s3847_s0] ss:$0 sm:$0xff] }
 0x139   : > { %v2123_v30 = vadd.s32 4294967294, %v818_v25  ;;  %v1105_v36 = vsel %vm1095_vm6, %v1102_v28, %v1104_v50  ;;  %v1108_v38 = vsel %vm1096_vm8, %v1090_v12, %v1107_v33  ;;  %v962_v41 = vshrl.u32 %v961_v40, 23  ;;  %v252_v25 = vpop.permute.xlu0 %251 }
 0x13a   : > { %v1109_v45 = vsel %vm1095_vm6, %v1106_v9, %v1108_v38  ;;  %v3065_v10 = vmul.u32.u64.low %v3038_v31, %v1105_v36  ;;  %v3066_v37 = vmul.u32.u64.high %v3038_v31, %v1105_v36, %v3065_v10  ;;  %v837_v47 = vsel %vm752_vm4, %v836_v2, %v812_v57 }
 0x13b   : > { %vm2124_vm10 = vcmp.lt.s32.totalorder %v2123_v30, 0  ;;  %v3072_v49 = vmul.u32.u64.low %v3038_v31, %v1109_v45  ;;  %v3073_v56 = vmul.u32.u64.high %v3038_v31, %v1109_v45, %v3072_v49  ;;  %v1101_v53 = vsel %vm1095_vm6, %v1098_v34, %v1100_v14 }
 0x13c   : > { %v821_v43 = vsel %vm2124_vm10, 0, %v2123_v30  ;;  %v2129_v42 = vadd.s32 4294967169, %v962_v41  ;;  %vm949_vm9 = vcmp.lt.s32.totalorder %v3025_v20, 2  ;;  %vm950_vm11 = vcmp.eq.s32.totalorder %v3025_v20, 0 }
 0x13d   : > { %v822_v51 = vsub.s32 32, %v821_v43  ;;  %v826_v32 = vsub.s32 4294967266, %v821_v43  ;;  %vm3080_vm13 = vcmp.le.f32.partialorder %v750_v46, 0.7853982  ;;  %v823_v57 = vshll.u32 %v3045_v58, %v821_v43 }
 0x13e   : > { %v1120_v6 = vadd.s32 1, %v3066_v37  ;;  %v968_v60 = vadd.s32 1, %v2129_v42  ;;  %vm953_vm12 = vcmp.eq.s32.totalorder %v3025_v20, 2  ;;  %v839_v35 = vsel %vm3080_vm13, 0, %v837_v47 }
 0x13f   : > { %v824_v55 = vshrl.u32 %v806_v63, %v822_v51  ;;  %v827_v4 = vadd.s32 127, %v826_v32  ;;  %v1117_v5 = vmul.u32 %v3038_v31, %v1101_v53  ;;  %vm1119_vm14 = vc.u32 %v3073_v56, %v3065_v10 }
 0x140   : > { %v2309_v23 = vpop.eup %2308  ;;  %v1121_v63 = vsel %vm1119_vm14, %v1120_v6, %v3066_v37  ;;  %v958_v3 = vand.u32 2147483647, %v3034_v27  ;;  %vm969_vm15 = vcmp.gt.s32.totalorder %v968_v60, 0  ;;  %v843_v40 = vadd.s32 3, %v839_v35 }
 0x141   : > { %v2311_v46 = vpop.eup %2310  ;;  %v954_v1 = vxor.u32 2147483648, %v2309_v23  ;;  %v825_v18 = vor.u32 %v824_v55, %v823_v57  ;;  %v828_v58 = vshll.u32 %v827_v4, 23  ;;  %v1122_v22 = vadd.s32 %v1121_v63, %v1117_v5 }
 0x142   : > { %v951_v54 = vxor.u32 2147483648, %v2311_v46  ;;  %v970_v31 = vsel %vm969_vm15, %v968_v60, 0  ;;  %v304_v62 = vmul.f32 %v3099_v19, %v257_v44  ;;  %vm946_vm0 = vweird.f32 %v2747_v21 }
 0x143   : > { %v955_v61 = vsel %vm953_vm12, %v954_v1, %v2311_v46  ;;  %v829_v12 = vor.u32 4788187, %v828_v58  ;;  %v1123_v59 = vadd.s32 536870912, %v1122_v22  ;;  %v972_v2 = vand.u32 31, %v970_v31 }
 0x144   : > { %v952_v16 = vsel %vm950_vm11, %v2309_v23, %v951_v54  ;;  %v832_v8 = vcvt.s32.f32 %v825_v18  ;;  %v965_v34 = vand.u32 8388607, %v958_v3  ;;  %v3108_v14 = vand.u32 3, %v843_v40 }
 0x145   : > { %v956_v28 = vsel %vm949_vm9, %v952_v16, %v955_v61  ;;  %v830_v29 = vand.u32 2147483647, %v829_v12  ;;  %v1124_v30 = vshrl.u32 %v1123_v59, 30  ;;  %v973_v50 = vsub.s32 32, %v972_v2 }
 0x146   : > { %v957_v9 = vsel %vm946_vm0, nan, %v956_v28  ;;  %v3111_v36 = vmul.f32 %v3099_v19, %v252_v25  ;;  %v975_v21 = vshll.u32 %v2425_v7, %v972_v2  ;;  %v3116_v41 = vadd.f32 %v3030_v52, %v304_v62 }
 0x147   : > { %2003 = vst [vmem:[%s2819_s9 + $0x28] sm:$0xff] %v957_v9  ;;  %v833_v33 = vmul.f32 %v832_v8, %v830_v29  ;;  %v1125_v38 = vshll.u32 %v1124_v30, 30  ;;  %v976_v20 = vshrl.u32 %v2426_v11, %v973_v50  ;;  %v979_v37 = vshrl.u32 %v2427_v13, %v973_v50 }
 0x148   : > { %v982_v43 = vshrl.u32 %v2428_v15, %v973_v50  ;;  %v985_v47 = vshrl.u32 %v2429_v17, %v973_v50  ;;  %v966_v51 = vor.u32 8388608, %v965_v34  ;;  %v971_v32 = vshrl.u32 %v970_v31, 5 }
 0x149   : > { %v834_v45 = vxor.u32 2147483648, %v833_v33  ;;  %v3121_v49 = vsub.s32 %v1122_v22, %v1125_v38  ;;  %v978_v53 = vshll.u32 %v2426_v11, %v972_v2  ;;  %vm1064_vm1 = vcmp.lt.s32.totalorder %v2973_v39, 0 }
 0x14a   : > { %v977_v57 = vor.u32 %v976_v20, %v975_v21  ;;  %v981_v55 = vshll.u32 %v2427_v13, %v972_v2  ;;  %v984_v4 = vshll.u32 %v2428_v15, %v972_v2  ;;  %v987_v35 = vshll.u32 %v2429_v17, %v972_v2 }
 0x14b   : > { %v835_v42 = vsel %vm752_vm4, %v834_v45, %v833_v33  ;;  %v1128_v60 = vsub.s32 0, %v3121_v49  ;;  %v980_v23 = vor.u32 %v979_v37, %v978_v53  ;;  %v988_v1 = vshrl.u32 %v2430_v24, %v973_v50 }
 0x14c   : > { %v838_v6 = vsel %vm3080_vm13, %v2858_v0, %v835_v42  ;;  %v983_v5 = vor.u32 %v982_v43, %v981_v55  ;;  %v986_v46 = vor.u32 %v985_v47, %v984_v4  ;;  %vm3137_vm2 = vcmp.le.f32.partialorder %v1062_v26, 0.7853982 }
 0x14d   : > { %2312 = vcosq.f32 %v838_v6  ;;  %v2134_v48 = vmin.u32 %v1128_v60, %v3121_v49  ;;  %v1148_v58 = vsub.s32 4, %v1124_v30  ;;  %v1006_v63 = vshll.u32 %v966_v51, 8 }
 0x14e   : > { %2314 = vsinq.f32 %v838_v6  ;;  %v974_v44 = vshrl.u32 %v2425_v7, %v973_v50  ;;  %v989_v54 = vor.u32 %v988_v1, %v987_v35  ;;  %vm990_vm3 = vcmp.lt.s32.totalorder %v971_v32, 1 }
 0x14f   : > { %vm991_vm4 = vcmp.lt.s32.totalorder %v971_v32, 2  ;;  %v1130_v22 = vclz %v2134_v48  ;;  %vm992_vm5 = vcmp.lt.s32.totalorder %v971_v32, 3  ;;  %vm993_vm6 = vcmp.lt.s32.totalorder %v971_v32, 4 }
 0x150   : > { %v998_v61 = vsel %vm990_vm3, %v977_v57, %v980_v23  ;;  %v995_v12 = vsel %vm993_vm6, %v983_v5, 2102212464  ;;  %v999_v40 = vsel %vm993_vm6, %v986_v46, 920167782  ;;  %v1002_v31 = vsel %vm990_vm3, %v980_v23, %v983_v5 }
 0x151   : > { %v1003_v26 = vsel %vm993_vm6, %v989_v54, 1326507024  ;;  %vm846_vm7 = vcmp.eq.s32.totalorder %v3108_v14, 0  ;;  %v2135_v16 = vadd.s32 4294967294, %v1130_v22  ;;  %v994_v59 = vsel %vm990_vm3, %v974_v44, %v977_v57 }
 0x152   : > { %v1000_v2 = vsel %vm992_vm5, %v983_v5, %v999_v40  ;;  %v1004_v62 = vsel %vm992_vm5, %v986_v46, %v1003_v26  ;;  %v996_v25 = vsel %vm992_vm5, %v980_v23, %v995_v12  ;;  %v1273_v8 = vand.u32 2139095040, %v3116_v41 }
 0x153   : > { %v1001_v28 = vsel %vm991_vm4, %v998_v61, %v1000_v2  ;;  %v1005_v29 = vsel %vm991_vm4, %v1002_v31, %v1004_v62  ;;  %vm2136_vm8 = vcmp.lt.s32.totalorder %v2135_v16, 0  ;;  %v1149_v9 = vsel %vm1064_vm1, %v1148_v58, %v1124_v30 }
 0x154   : > { %v3149_v34 = vmul.u32.u64.low %v1006_v63, %v1005_v29  ;;  %v3150_v50 = vmul.u32.u64.high %v1006_v63, %v1005_v29, %v3149_v34  ;;  %v1133_v33 = vsel %vm2136_vm8, 0, %v2135_v16  ;;  %v1274_v20 = vshrl.u32 %v1273_v8, 23 }
 0x155   : > { %v3152_v38 = vmul.u32.u64.low %v1006_v63, %v1001_v28  ;;  %v3153_v21 = vmul.u32.u64.high %v1006_v63, %v1001_v28, %v3152_v38  ;;  %v1118_v45 = vadd.s32 %v3065_v10, %v3073_v56  ;;  %v1134_v37 = vsub.s32 32, %v1133_v33 }
 0x156   : > { %v1138_v43 = vsub.s32 4294967266, %v1133_v33  ;;  %v997_v47 = vsel %vm991_vm4, %v994_v59, %v996_v25  ;;  %vm849_vm10 = vcmp.eq.s32.totalorder %v3108_v14, 2  ;;  %v1151_v30 = vsel %vm3137_vm2, 0, %v1149_v9 }
 0x157   : > { %v2313_v51 = vpop.eup %2312  ;;  %v1270_v53 = vand.u32 2147483647, %v3116_v41  ;;  %v2141_v42 = vadd.s32 4294967169, %v1274_v20  ;;  %v1135_v4 = vshll.u32 %v3121_v49, %v1133_v33  ;;  %v1136_v6 = vshrl.u32 %v1118_v45, %v1134_v37 }
 0x158   : > { %v2315_v57 = vpop.eup %2314  ;;  %v850_v55 = vxor.u32 2147483648, %v2313_v51  ;;  %v1139_v60 = vadd.s32 127, %v1138_v43  ;;  %v1013_v56 = vmul.u32 %v1006_v63, %v997_v47  ;;  %vm1015_vm9 = vc.u32 %v3150_v50, %v3152_v38 }
 0x159   : > { %v847_v10 = vxor.u32 2147483648, %v2315_v57  ;;  %v1016_v32 = vadd.s32 1, %v3153_v21  ;;  %v1137_v35 = vor.u32 %v1136_v6, %v1135_v4  ;;  %v1280_v46 = vadd.s32 1, %v2141_v42 }
 0x15a   : > { %v851_v23 = vsel %vm849_vm10, %v850_v55, %v2315_v57  ;;  %v1140_v5 = vshll.u32 %v1139_v60, 23  ;;  %vm842_vm11 = vweird.f32 %v2858_v0  ;;  %vm845_vm13 = vcmp.lt.s32.totalorder %v3108_v14, 2 }
 0x15b   : > { %v848_v49 = vsel %vm846_vm7, %v2313_v51, %v847_v10  ;;  %v1017_v1 = vsel %vm1015_vm9, %v1016_v32, %v3153_v21  ;;  %v3174_v44 = vadd.f32 %v3030_v52, %v3111_v36  ;;  %v1155_v22 = vadd.s32 3, %v1151_v30 }
 0x15c   : > { %v852_v48 = vsel %vm845_vm13, %v848_v49, %v851_v23  ;;  %v1141_v58 = vor.u32 4788187, %v1140_v5  ;;  %v1018_v63 = vadd.s32 %v1017_v1, %v1013_v56  ;;  %v1277_v61 = vand.u32 8388607, %v1270_v53 }
 0x15d   : > { %v853_v54 = vsel %vm842_vm11, nan, %v852_v48  ;;  %vm1281_vm12 = vcmp.gt.s32.totalorder %v1280_v46, 0  ;;  %v1144_v12 = vcvt.s32.f32 %v1137_v35  ;;  %vm960_vm14 = vcmp.lt.s32.totalorder %v3034_v27, 0 }
 0x15e   : > { %2002 = vst [vmem:[%s2819_s9 + $0x20] sm:$0xff] %v853_v54  ;;  %v1142_v0 = vand.u32 2147483647, %v1141_v58  ;;  %v1019_v14 = vadd.s32 536870912, %v1018_v63  ;;  %v1282_v40 = vsel %vm1281_vm12, %v1280_v46, 0  ;;  %v3180_v59 = vand.u32 3, %v1155_v22 }
 0x15f   : > { %v1284_v31 = vand.u32 31, %v1282_v40  ;;  %v1278_v36 = vor.u32 8388608, %v1277_v61  ;;  %v1169_v62 = vand.u32 2139095040, %v3174_v44  ;;  %v1283_v29 = vshrl.u32 %v1282_v40, 5 }
 0x160   : > { %v1145_v26 = vmul.f32 %v1144_v12, %v1142_v0  ;;  %v1020_v16 = vshrl.u32 %v1019_v14, 30  ;;  %vm3203_vm15 = vcmp.le.f32.partialorder %v958_v3, 0.7853982  ;;  %v1166_v23 = vand.u32 2147483647, %v3174_v44 }
 0x161   : > { %v1285_v2 = vsub.s32 32, %v1284_v31  ;;  %v1287_v8 = vshll.u32 %v2425_v7, %v1284_v31  ;;  %v1290_v34 = vshll.u32 %v2426_v11, %v1284_v31  ;;  %v1293_v37 = vshll.u32 %v2427_v13, %v1284_v31 }
 0x162   : > { %v1146_v25 = vxor.u32 2147483648, %v1145_v26  ;;  %v1021_v28 = vshll.u32 %v1020_v16, 30  ;;  %v1044_v51 = vsub.s32 4, %v1020_v16  ;;  %v1296_v42 = vshll.u32 %v2428_v15, %v1284_v31 }
 0x163   : > { %v1288_v9 = vshrl.u32 %v2426_v11, %v1285_v2  ;;  %v1291_v33 = vshrl.u32 %v2427_v13, %v1285_v2  ;;  %v1294_v21 = vshrl.u32 %v2428_v15, %v1285_v2  ;;  %v1297_v43 = vshrl.u32 %v2429_v17, %v1285_v2 }
 0x164   : > { %v1147_v20 = vsel %vm1064_vm1, %v1146_v25, %v1145_v26  ;;  %v3190_v45 = vsub.s32 %v1018_v63, %v1021_v28  ;;  %v1299_v60 = vshll.u32 %v2429_v17, %v1284_v31  ;;  %v1300_v10 = vshrl.u32 %v2430_v24, %v1285_v2 }
 0x165   : > { %v1150_v47 = vsel %vm3137_vm2, %v2973_v39, %v1147_v20  ;;  %v1289_v30 = vor.u32 %v1288_v9, %v1287_v8  ;;  %v1292_v55 = vor.u32 %v1291_v33, %v1290_v34  ;;  %v1295_v4 = vor.u32 %v1294_v21, %v1293_v37 }
 0x166   : > { %2316 = vcosq.f32 %v1150_v47  ;;  %v1024_v57 = vsub.s32 0, %v3190_v45  ;;  %v1298_v6 = vor.u32 %v1297_v43, %v1296_v42  ;;  %v1318_v32 = vshll.u32 %v1278_v36, 8 }
 0x167   : > { %2318 = vsinq.f32 %v1150_v47  ;;  %v1170_v35 = vshrl.u32 %v1169_v62, 23  ;;  %v1045_v5 = vsel %vm960_vm14, %v1044_v51, %v1020_v16  ;;  %v1286_v46 = vshrl.u32 %v2425_v7, %v1285_v2 }
 0x168   : > { %v2130_v56 = vmin.u32 %v1024_v57, %v3190_v45  ;;  %v1301_v49 = vor.u32 %v1300_v10, %v1299_v60  ;;  %vm1302_vm0 = vcmp.lt.s32.totalorder %v1283_v29, 1  ;;  %vm1161_vm1 = vcmp.eq.s32.totalorder %v3180_v59, 2 }
 0x169   : > { %vm1303_vm2 = vcmp.lt.s32.totalorder %v1283_v29, 2  ;;  %vm1304_vm3 = vcmp.lt.s32.totalorder %v1283_v29, 3  ;;  %vm1305_vm4 = vcmp.lt.s32.totalorder %v1283_v29, 4  ;;  %vm1158_vm5 = vcmp.eq.s32.totalorder %v3180_v59, 0 }
 0x16a   : > { %v1026_v1 = vclz %v2130_v56  ;;  %v1307_v3 = vsel %vm1305_vm4, %v1295_v4, 2102212464  ;;  %v1310_v48 = vsel %vm1302_vm0, %v1289_v30, %v1292_v55  ;;  %v1311_v58 = vsel %vm1305_vm4, %v1298_v6, 920167782 }
 0x16b   : > { %v1314_v63 = vsel %vm1302_vm0, %v1292_v55, %v1295_v4  ;;  %vm1157_vm6 = vcmp.lt.s32.totalorder %v3180_v59, 2  ;;  %v1306_v22 = vsel %vm1302_vm0, %v1286_v46, %v1289_v30  ;;  %v1312_v61 = vsel %vm1304_vm3, %v1295_v4, %v1311_v58 }
 0x16c   : > { %v2131_v54 = vadd.s32 4294967294, %v1026_v1  ;;  %v1315_v0 = vsel %vm1305_vm4, %v1301_v49, 1326507024  ;;  %vm1154_vm7 = vweird.f32 %v2973_v39  ;;  %v1308_v12 = vsel %vm1304_vm3, %v1292_v55, %v1307_v3  ;;  %v262_v1 = vpop.permute.xlu0 %261 }
 0x16d   : > { %v1313_v14 = vsel %vm1303_vm2, %v1310_v48, %v1312_v61  ;;  %v1316_v40 = vsel %vm1304_vm3, %v1298_v6, %v1315_v0  ;;  %v2137_v31 = vadd.s32 4294967169, %v1170_v35  ;;  %v1014_v2 = vadd.s32 %v3152_v38, %v3150_v50 }
 0x16e   : > { %vm2132_vm8 = vcmp.lt.s32.totalorder %v2131_v54, 0  ;;  %v1317_v26 = vsel %vm1303_vm2, %v1314_v63, %v1316_v40  ;;  %v3218_v16 = vmul.u32.u64.low %v1318_v32, %v1313_v14  ;;  %v3219_v36 = vmul.u32.u64.high %v1318_v32, %v1313_v14, %v3218_v16 }
 0x16f   : > { %v1029_v62 = vsel %vm2132_vm8, 0, %v2131_v54  ;;  %v3224_v25 = vmul.u32.u64.low %v1318_v32, %v1317_v26  ;;  %v3225_v28 = vmul.u32.u64.high %v1318_v32, %v1317_v26, %v3224_v25  ;;  %v1309_v33 = vsel %vm1303_vm2, %v1306_v22, %v1308_v12 }
 0x170   : > { %v2317_v8 = vpop.eup %2316  ;;  %v1030_v9 = vsub.s32 32, %v1029_v62  ;;  %v1034_v34 = vsub.s32 4294967266, %v1029_v62  ;;  %v1176_v21 = vadd.s32 1, %v2137_v31  ;;  %v1031_v43 = vshll.u32 %v3190_v45, %v1029_v62 }
 0x171   : > { %v2319_v20 = vpop.eup %2318  ;;  %v1162_v37 = vxor.u32 2147483648, %v2317_v8  ;;  %v1047_v47 = vsel %vm3203_vm15, 0, %v1045_v5  ;;  %v1173_v50 = vand.u32 8388607, %v1166_v23  ;;  %v1328_v42 = vadd.s32 1, %v3219_v36  ;;  %v267_v5 = vpop.permute.xlu1 %266 }
 0x172   : > { %v1159_v38 = vxor.u32 2147483648, %v2319_v20  ;;  %v1032_v51 = vshrl.u32 %v1014_v2, %v1030_v9  ;;  %v1035_v30 = vadd.s32 127, %v1034_v34  ;;  %v1325_v57 = vmul.u32 %v1318_v32, %v1309_v33 }
 0x173   : > { %v1163_v29 = vsel %vm1161_vm1, %v1162_v37, %v2319_v20  ;;  %vm1327_vm10 = vc.u32 %v3225_v28, %v3218_v16  ;;  %vm1177_vm9 = vcmp.gt.s32.totalorder %v1176_v21, 0  ;;  %v1051_v10 = vadd.s32 3, %v1047_v47 }
 0x174   : > { %v1160_v45 = vsel %vm1158_vm5, %v2317_v8, %v1159_v38  ;;  %v1033_v55 = vor.u32 %v1032_v51, %v1031_v43  ;;  %v1036_v4 = vshll.u32 %v1035_v30, 23  ;;  %v1329_v6 = vsel %vm1327_vm10, %v1328_v42, %v3219_v36 }
 0x175   : > { %v1164_v60 = vsel %vm1157_vm6, %v1160_v45, %v1163_v29  ;;  %v1330_v56 = vadd.s32 %v1329_v6, %v1325_v57  ;;  %v1178_v35 = vsel %vm1177_vm9, %v1176_v21, 0  ;;  %v1174_v49 = vor.u32 8388608, %v1173_v50 }
 0x176   : > { %v1165_v32 = vsel %vm1154_vm7, nan, %v1164_v60  ;;  %v1037_v46 = vor.u32 4788187, %v1036_v4  ;;  %v1180_v48 = vand.u32 31, %v1178_v35  ;;  %v1040_v63 = vcvt.s32.f32 %v1033_v55 }
 0x177   : > { %2005 = vst [vmem:[%s2819_s9 + $0x38] sm:$0xff] %v1165_v32  ;;  %v1331_v3 = vadd.s32 536870912, %v1330_v56  ;;  %v306_v54 = vmul.f32 %v3099_v19, %v267_v5  ;;  %v3247_v22 = vand.u32 3, %v1051_v10  ;;  %v3250_v0 = vmul.f32 %v3099_v19, %v262_v1 }
 0x178   : > { %v1038_v58 = vand.u32 2147483647, %v1037_v46  ;;  %v1181_v61 = vsub.s32 32, %v1180_v48  ;;  %vm1272_vm11 = vcmp.lt.s32.totalorder %v3116_v41, 0  ;;  %v3253_v39 = vshrl.u32 %v1178_v35, 5 }
 0x179   : > { %v1332_v59 = vshrl.u32 %v1331_v3, 30  ;;  %v1183_v14 = vshll.u32 %v2425_v7, %v1180_v48  ;;  %v3256_v40 = vshll.u32 %v1174_v49, 8  ;;  %v1186_v36 = vshll.u32 %v2426_v11, %v1180_v48 }
 0x17a   : > { %v1041_v12 = vmul.f32 %v1040_v63, %v1038_v58  ;;  %v1184_v26 = vshrl.u32 %v2426_v11, %v1181_v61  ;;  %v1189_v2 = vshll.u32 %v2427_v13, %v1180_v48  ;;  %v1187_v25 = vshrl.u32 %v2427_v13, %v1181_v61 }
 0x17b   : > { %v1333_v31 = vshll.u32 %v1332_v59, 30  ;;  %v1190_v8 = vshrl.u32 %v2428_v15, %v1181_v61  ;;  %v1193_v9 = vshrl.u32 %v2429_v17, %v1181_v61  ;;  %v1192_v33 = vshll.u32 %v2428_v15, %v1180_v48 }
 0x17c   : > { %v1042_v62 = vxor.u32 2147483648, %v1041_v12  ;;  %v1195_v21 = vshll.u32 %v2429_v17, %v1180_v48  ;;  %v1196_v20 = vshrl.u32 %v2430_v24, %v1181_v61  ;;  %vm3273_vm13 = vcmp.le.f32.partialorder %v1270_v53, 0.7853982 }
 0x17d   : > { %v3264_v34 = vsub.s32 %v1330_v56, %v1333_v31  ;;  %v1185_v47 = vor.u32 %v1184_v26, %v1183_v14  ;;  %v1188_v50 = vor.u32 %v1187_v25, %v1186_v36  ;;  %v1191_v38 = vor.u32 %v1190_v8, %v1189_v2 }
 0x17e   : > { %v1043_v37 = vsel %vm960_vm14, %v1042_v62, %v1041_v12  ;;  %v1356_v42 = vsub.s32 4, %v1332_v59  ;;  %v1194_v29 = vor.u32 %v1193_v9, %v1192_v33  ;;  %v1197_v57 = vor.u32 %v1196_v20, %v1195_v21 }
 0x17f   : > { %v1046_v51 = vsel %vm3203_vm15, %v3034_v27, %v1043_v37  ;;  %v1336_v30 = vsub.s32 0, %v3264_v34  ;;  %vm1198_vm12 = vcmp.lt.s32.totalorder %v3253_v39, 1  ;;  %v3283_v53 = vadd.f32 %v3030_v52, %v306_v54 }
 0x180   : > { %2320 = vcosq.f32 %v1046_v51  ;;  %vm1199_vm14 = vcmp.lt.s32.totalorder %v3253_v39, 2  ;;  %vm1201_vm0 = vcmp.lt.s32.totalorder %v3253_v39, 4  ;;  %v1182_v18 = vshrl.u32 %v2425_v7, %v1181_v61 }
 0x181   : > { %2322 = vsinq.f32 %v1046_v51  ;;  %v2142_v45 = vmin.u32 %v1336_v30, %v3264_v34  ;;  %v1203_v55 = vsel %vm1201_vm0, %v1191_v38, 2102212464  ;;  %v1206_v4 = vsel %vm1198_vm12, %v1185_v47, %v1188_v50 }
 0x182   : > { %v1207_v6 = vsel %vm1201_vm0, %v1194_v29, 920167782  ;;  %v1357_v10 = vsel %vm1272_vm11, %v1356_v42, %v1332_v59  ;;  %vm1200_vm15 = vcmp.lt.s32.totalorder %v3253_v39, 3  ;;  %v1210_v56 = vsel %vm1198_vm12, %v1188_v50, %v1191_v38 }
 0x183   : > { %v1338_v60 = vclz %v2142_v45  ;;  %v1202_v35 = vsel %vm1198_vm12, %v1182_v18, %v1185_v47  ;;  %v1208_v5 = vsel %vm1200_vm15, %v1191_v38, %v1207_v6  ;;  %v1211_v32 = vsel %vm1201_vm0, %v1197_v57, 1326507024 }
 0x184   : > { %v1481_v46 = vand.u32 2139095040, %v3283_v53  ;;  %vm1054_vm1 = vcmp.eq.s32.totalorder %v3247_v22, 0  ;;  %v1204_v1 = vsel %vm1200_vm15, %v1188_v50, %v1203_v55  ;;  %v1209_v3 = vsel %vm1199_vm14, %v1206_v4, %v1208_v5 }
 0x185   : > { %v2143_v49 = vadd.s32 4294967294, %v1338_v60  ;;  %v1212_v48 = vsel %vm1200_vm15, %v1194_v29, %v1211_v32  ;;  %vm1053_vm2 = vcmp.lt.s32.totalorder %v3247_v22, 2  ;;  %v1359_v61 = vsel %vm3273_vm13, 0, %v1357_v10 }
 0x186   : > { %v1213_v58 = vsel %vm1199_vm14, %v1210_v56, %v1212_v48  ;;  %v3300_v63 = vmul.u32.u64.low %v3256_v40, %v1209_v3  ;;  %v3301_v54 = vmul.u32.u64.high %v3256_v40, %v1209_v3, %v3300_v63  ;;  %v1482_v59 = vshrl.u32 %v1481_v46, 23 }
 0x187   : > { %vm2144_vm3 = vcmp.lt.s32.totalorder %v2143_v49, 0  ;;  %v3307_v12 = vmul.u32.u64.low %v3256_v40, %v1213_v58  ;;  %v3308_v14 = vmul.u32.u64.high %v3256_v40, %v1213_v58, %v3307_v12  ;;  %vm1057_vm4 = vcmp.eq.s32.totalorder %v3247_v22, 2 }
 0x188   : > { %v1341_v31 = vsel %vm2144_vm3, 0, %v2143_v49  ;;  %v2149_v26 = vadd.s32 4294967169, %v1482_v59  ;;  %v3313_v36 = vadd.f32 %v3030_v52, %v3250_v0  ;;  %v1326_v2 = vadd.s32 %v3218_v16, %v3225_v28 }
 0x189   : > { %v1342_v62 = vsub.s32 32, %v1341_v31  ;;  %v1346_v25 = vsub.s32 4294967266, %v1341_v31  ;;  %v1205_v8 = vsel %vm1199_vm14, %v1202_v35, %v1204_v1  ;;  %v1363_v33 = vadd.s32 3, %v1359_v61 }
 0x18a   : > { %v2321_v9 = vpop.eup %2320  ;;  %v1224_v21 = vadd.s32 1, %v3301_v54  ;;  %v1478_v20 = vand.u32 2147483647, %v3283_v53  ;;  %v1488_v37 = vadd.s32 1, %v2149_v26  ;;  %v1343_v52 = vshll.u32 %v3264_v34, %v1341_v31 }
 0x18b   : > { %v2323_v47 = vpop.eup %2322  ;;  %v1058_v50 = vxor.u32 2147483648, %v2321_v9  ;;  %v1344_v0 = vshrl.u32 %v1326_v2, %v1342_v62  ;;  %v1347_v38 = vadd.s32 127, %v1346_v25  ;;  %v1221_v16 = vmul.u32 %v3256_v40, %v1205_v8 }
 0x18c   : > { %v1055_v51 = vxor.u32 2147483648, %v2323_v47  ;;  %vm1223_vm5 = vc.u32 %v3308_v14, %v3300_v63  ;;  %vm1489_vm6 = vcmp.gt.s32.totalorder %v1488_v37, 0  ;;  %v1485_v57 = vand.u32 8388607, %v1478_v20 }
 0x18d   : > { %v1059_v28 = vsel %vm1057_vm4, %v1058_v50, %v2323_v47  ;;  %v1345_v39 = vor.u32 %v1344_v0, %v1343_v52  ;;  %v1348_v30 = vshll.u32 %v1347_v38, 23  ;;  %v1225_v42 = vsel %vm1223_vm5, %v1224_v21, %v3301_v54 }
 0x18e   : > { %v1056_v34 = vsel %vm1054_vm1, %v2321_v9, %v1055_v51  ;;  %v1226_v29 = vadd.s32 %v1225_v42, %v1221_v16  ;;  %v1490_v40 = vsel %vm1489_vm6, %v1488_v37, 0  ;;  %vm1050_vm7 = vweird.f32 %v3034_v27 }
 0x18f   : > { %v1060_v45 = vsel %vm1053_vm2, %v1056_v34, %v1059_v28  ;;  %v1349_v18 = vor.u32 4788187, %v1348_v30  ;;  %v1377_v55 = vand.u32 2139095040, %v3313_v36  ;;  %v1492_v60 = vand.u32 31, %v1490_v40 }
 0x190   : > { %v1061_v4 = vsel %vm1050_vm7, nan, %v1060_v45  ;;  %v1227_v6 = vadd.s32 536870912, %v1226_v29  ;;  %v1352_v56 = vcvt.s32.f32 %v1345_v39  ;;  %v3337_v35 = vand.u32 3, %v1363_v33 }
 0x191   : > { %2004 = vst [vmem:[%s2819_s9 + $0x30] sm:$0xff] %v1061_v4  ;;  %v1350_v10 = vand.u32 2147483647, %v1349_v18  ;;  %v1486_v32 = vor.u32 8388608, %v1485_v57  ;;  %v1493_v46 = vsub.s32 32, %v1492_v60  ;;  %v1491_v1 = vshrl.u32 %v1490_v40, 5 }
 0x192   : > { %v1228_v5 = vshrl.u32 %v1227_v6, 30  ;;  %v1495_v27 = vshll.u32 %v2425_v7, %v1492_v60  ;;  %v1378_v22 = vshrl.u32 %v1377_v55, 23  ;;  %v1498_v58 = vshll.u32 %v2426_v11, %v1492_v60 }
 0x193   : > { %v1353_v49 = vmul.f32 %v1352_v56, %v1350_v10  ;;  %v1496_v48 = vshrl.u32 %v2426_v11, %v1493_v46  ;;  %v1501_v54 = vshll.u32 %v2427_v13, %v1492_v60  ;;  %vm1168_vm8 = vcmp.lt.s32.totalorder %v3174_v44, 0 }
 0x194   : > { %v1229_v3 = vshll.u32 %v1228_v5, 30  ;;  %v1499_v61 = vshrl.u32 %v2427_v13, %v1493_v46  ;;  %v1502_v12 = vshrl.u32 %v2428_v15, %v1493_v46  ;;  %v1505_v31 = vshrl.u32 %v2429_v17, %v1493_v46 }
 0x195   : > { %v1354_v59 = vxor.u32 2147483648, %v1353_v49  ;;  %v1504_v2 = vshll.u32 %v2428_v15, %v1492_v60  ;;  %v1507_v62 = vshll.u32 %v2429_v17, %v1492_v60  ;;  %v1508_v25 = vshrl.u32 %v2430_v24, %v1493_v46 }
 0x196   : > { %v3347_v26 = vsub.s32 %v1226_v29, %v1229_v3  ;;  %v1497_v9 = vor.u32 %v1496_v48, %v1495_v27  ;;  %v1500_v33 = vor.u32 %v1499_v61, %v1498_v58  ;;  %v1503_v21 = vor.u32 %v1502_v12, %v1501_v54 }
 0x197   : > { %v1355_v8 = vsel %vm1272_vm11, %v1354_v59, %v1353_v49  ;;  %v1506_v50 = vor.u32 %v1505_v31, %v1504_v2  ;;  %vm1510_vm10 = vcmp.lt.s32.totalorder %v1491_v1, 1  ;;  %v1252_v52 = vsub.s32 4, %v1228_v5 }
 0x198   : > { %v1358_v37 = vsel %vm3273_vm13, %v3116_v41, %v1355_v8  ;;  %v1232_v47 = vsub.s32 0, %v3347_v26  ;;  %v1509_v0 = vor.u32 %v1508_v25, %v1507_v62  ;;  %vm1513_vm9 = vcmp.lt.s32.totalorder %v1491_v1, 4 }
 0x199   : > { %2324 = vcosq.f32 %v1358_v37  ;;  %vm3360_vm12 = vcmp.le.f32.partialorder %v1166_v23, 0.7853982  ;;  %v1494_v43 = vshrl.u32 %v2425_v7, %v1493_v46  ;;  %v1515_v16 = vsel %vm1513_vm9, %v1503_v21, 2102212464 }
 0x19a   : > { %2326 = vsinq.f32 %v1358_v37  ;;  %v2138_v51 = vmin.u32 %v1232_v47, %v3347_v26  ;;  %vm1512_vm11 = vcmp.lt.s32.totalorder %v1491_v1, 3  ;;  %v1518_v28 = vsel %vm1510_vm10, %v1497_v9, %v1500_v33 }
 0x19b   : > { %v1519_v39 = vsel %vm1513_vm9, %v1506_v50, 920167782  ;;  %v1526_v30 = vshll.u32 %v1486_v32, 8  ;;  %v1514_v34 = vsel %vm1510_vm10, %v1494_v43, %v1497_v9  ;;  %v1516_v29 = vsel %vm1512_vm11, %v1500_v33, %v1515_v16 }
 0x19c   : > { %v1234_v42 = vclz %v2138_v51  ;;  %v1522_v23 = vsel %vm1510_vm10, %v1500_v33, %v1503_v21  ;;  %vm1511_vm13 = vcmp.lt.s32.totalorder %v1491_v1, 2  ;;  %v1520_v57 = vsel %vm1512_vm11, %v1503_v21, %v1519_v39 }
 0x19d   : > { %v1523_v40 = vsel %vm1513_vm9, %v1509_v0, 1326507024  ;;  %v2145_v45 = vadd.s32 4294967169, %v1378_v22  ;;  %v1253_v55 = vsel %vm1168_vm8, %v1252_v52, %v1228_v5  ;;  %v1521_v4 = vsel %vm1511_vm13, %v1518_v28, %v1520_v57  ;;  %v277_v0 = vpop.permute.xlu1 %276 }
 0x19e   : > { %v2139_v18 = vadd.s32 4294967294, %v1234_v42  ;;  %v1524_v6 = vsel %vm1512_vm11, %v1506_v50, %v1523_v40  ;;  %v1517_v60 = vsel %vm1511_vm13, %v1514_v34, %v1516_v29  ;;  %vm1366_vm0 = vcmp.eq.s32.totalorder %v3337_v35, 0 }
 0x19f   : > { %v1525_v10 = vsel %vm1511_vm13, %v1522_v23, %v1524_v6  ;;  %v3374_v56 = vmul.u32.u64.low %v1526_v30, %v1521_v4  ;;  %v3375_v32 = vmul.u32.u64.high %v1526_v30, %v1521_v4, %v3374_v56  ;;  %v1384_v27 = vadd.s32 1, %v2145_v45 }
 0x1a0   : > { %vm2140_vm14 = vcmp.lt.s32.totalorder %v2139_v18, 0  ;;  %v3378_v46 = vmul.u32.u64.low %v1526_v30, %v1525_v10  ;;  %v3379_v49 = vmul.u32.u64.high %v1526_v30, %v1525_v10, %v3378_v46  ;;  %vm1369_vm15 = vcmp.eq.s32.totalorder %v3337_v35, 2 }
 0x1a1   : > { %v1237_v1 = vsel %vm2140_vm14, 0, %v2139_v18  ;;  %v1374_v5 = vand.u32 2147483647, %v3313_v36  ;;  %v1222_v22 = vadd.s32 %v3300_v63, %v3308_v14  ;;  %vm1385_vm1 = vcmp.gt.s32.totalorder %v1384_v27, 0 }
 0x1a2   : > { %v1238_v3 = vsub.s32 32, %v1237_v1  ;;  %v1242_v48 = vsub.s32 4294967266, %v1237_v1  ;;  %v1255_v54 = vsel %vm3360_vm12, 0, %v1253_v55  ;;  %v1533_v59 = vmul.u32 %v1526_v30, %v1517_v60 }
 0x1a3   : > { %v2325_v58 = vpop.eup %2324  ;;  %v1536_v61 = vadd.s32 1, %v3375_v32  ;;  %v1386_v12 = vsel %vm1385_vm1, %v1384_v27, 0  ;;  %v1239_v62 = vshll.u32 %v3347_v26, %v1237_v1  ;;  %vm1535_vm2 = vc.u32 %v3379_v49, %v3374_v56 }
 0x1a4   : > { %v2327_v31 = vpop.eup %2326  ;;  %v1370_v2 = vxor.u32 2147483648, %v2325_v58  ;;  %v1240_v25 = vshrl.u32 %v1222_v22, %v1238_v3  ;;  %v1243_v8 = vadd.s32 127, %v1242_v48  ;;  %v1381_v63 = vand.u32 8388607, %v1374_v5 }
 0x1a5   : > { %v1367_v9 = vxor.u32 2147483648, %v2327_v31  ;;  %v1388_v14 = vand.u32 31, %v1386_v12  ;;  %v1537_v47 = vsel %vm1535_vm2, %v1536_v61, %v3375_v32  ;;  %vm1365_vm3 = vcmp.lt.s32.totalorder %v3337_v35, 2 }
 0x1a6   : > { %v1371_v33 = vsel %vm1369_vm15, %v1370_v2, %v2327_v31  ;;  %v1241_v21 = vor.u32 %v1240_v25, %v1239_v62  ;;  %v1244_v37 = vshll.u32 %v1243_v8, 23  ;;  %v1538_v50 = vadd.s32 %v1537_v47, %v1533_v59 }
 0x1a7   : > { %v1368_v26 = vsel %vm1366_vm0, %v2325_v58, %v1367_v9  ;;  %v1389_v52 = vsub.s32 32, %v1388_v14  ;;  %vm1362_vm4 = vweird.f32 %v3116_v41  ;;  %v1259_v16 = vadd.s32 3, %v1255_v54  ;;  %v3420_v54 = vld [vmem:[%s3848_s1] ss:$0 sm:$0xff] }
 0x1a8   : > { %v1372_v51 = vsel %vm1365_vm3, %v1368_v26, %v1371_v33  ;;  %v1245_v43 = vor.u32 4788187, %v1244_v37  ;;  %v1539_v39 = vadd.s32 536870912, %v1538_v50  ;;  %v1382_v30 = vor.u32 8388608, %v1381_v63 }
 0x1a9   : > { %v1373_v28 = vsel %vm1362_vm4, nan, %v1372_v51  ;;  %v1392_v42 = vshrl.u32 %v2426_v11, %v1389_v52  ;;  %v1248_v29 = vcvt.s32.f32 %v1241_v21  ;;  %v1395_v23 = vshrl.u32 %v2427_v13, %v1389_v52 }
 0x1aa   : > { %2007 = vst [vmem:[%s2819_s9 + $0x48] sm:$0xff] %v1373_v28  ;;  %v1246_v34 = vand.u32 2147483647, %v1245_v43  ;;  %v308_v35 = vmul.f32 %v3099_v19, %v277_v0  ;;  %v1540_v57 = vshrl.u32 %v1539_v39, 30  ;;  %v1391_v40 = vshll.u32 %v2425_v7, %v1388_v14 }
 0x1ab   : > { %v1398_v41 = vshrl.u32 %v2428_v15, %v1389_v52  ;;  %v1401_v45 = vshrl.u32 %v2429_v17, %v1389_v52  ;;  %v1387_v55 = vshrl.u32 %v1386_v12, 5  ;;  %v1394_v4 = vshll.u32 %v2426_v11, %v1388_v14 }
 0x1ac   : > { %v1249_v18 = vmul.f32 %v1248_v29, %v1246_v34  ;;  %v1400_v6 = vshll.u32 %v2428_v15, %v1388_v14  ;;  %v1541_v60 = vshll.u32 %v1540_v57, 30  ;;  %v1393_v10 = vor.u32 %v1392_v42, %v1391_v40 }
 0x1ad   : > { %v1397_v32 = vshll.u32 %v2427_v13, %v1388_v14  ;;  %v1404_v46 = vshrl.u32 %v2430_v24, %v1389_v52  ;;  %v1396_v27 = vor.u32 %v1395_v23, %v1394_v4  ;;  %v1403_v22 = vshll.u32 %v2429_v17, %v1388_v14 }
 0x1ae   : > { %v1250_v19 = vxor.u32 2147483648, %v1249_v18  ;;  %v1402_v1 = vor.u32 %v1401_v45, %v1400_v6  ;;  %v3413_v3 = vsub.s32 %v1538_v50, %v1541_v60  ;;  %v3415_v58 = vshll.u32 %v1382_v30, 8 }
 0x1af   : > { %v1399_v48 = vor.u32 %v1398_v41, %v1397_v32  ;;  %v3423_v59 = vadd.f32 %v3420_v54, %v308_v35  ;;  %v1390_v12 = vshrl.u32 %v2425_v7, %v1389_v52  ;;  %v1405_v31 = vor.u32 %v1404_v46, %v1403_v22 }
 0x1b0   : > { %v1251_v61 = vsel %vm1168_vm8, %v1250_v19, %v1249_v18  ;;  %vm1406_vm5 = vcmp.lt.s32.totalorder %v1387_v55, 1  ;;  %v1544_v62 = vsub.s32 0, %v3413_v3  ;;  %vm1407_vm6 = vcmp.lt.s32.totalorder %v1387_v55, 2 }
 0x1b1   : > { %v1254_v2 = vsel %vm3360_vm12, %v3174_v44, %v1251_v61  ;;  %vm1409_vm7 = vcmp.lt.s32.totalorder %v1387_v55, 4  ;;  %vm1408_vm10 = vcmp.lt.s32.totalorder %v1387_v55, 3  ;;  %v1414_v25 = vsel %vm1406_vm5, %v1393_v10, %v1396_v27 }
 0x1b2   : > { %2328 = vcosq.f32 %v1254_v2  ;;  %v1415_v8 = vsel %vm1409_vm7, %v1402_v1, 920167782  ;;  %v2150_v9 = vmin.u32 %v1544_v62, %v3413_v3  ;;  %v1411_v63 = vsel %vm1409_vm7, %v1399_v48, 2102212464 }
 0x1b3   : > { %2330 = vsinq.f32 %v1254_v2  ;;  %v1416_v14 = vsel %vm1408_vm10, %v1399_v48, %v1415_v8  ;;  %v1564_v33 = vsub.s32 4, %v1540_v57  ;;  %v1418_v38 = vsel %vm1406_vm5, %v1396_v27, %v1399_v48 }
 0x1b4   : > { %v1417_v21 = vsel %vm1407_vm6, %v1414_v25, %v1416_v14  ;;  %v1419_v37 = vsel %vm1409_vm7, %v1405_v31, 1326507024  ;;  %v1260_v47 = vand.u32 3, %v1259_v16  ;;  %v1546_v26 = vclz %v2150_v9 }
 0x1b5   : > { %v1410_v50 = vsel %vm1406_vm5, %v1390_v12, %v1393_v10  ;;  %v1412_v52 = vsel %vm1408_vm10, %v1396_v27, %v1411_v63  ;;  %v1420_v0 = vsel %vm1408_vm10, %v1402_v1, %v1419_v37  ;;  %vm1480_vm8 = vcmp.lt.s32.totalorder %v3283_v53, 0 }
 0x1b6   : > { %v3438_v51 = vmul.u32.u64.low %v3415_v58, %v1417_v21  ;;  %v3439_v43 = vmul.u32.u64.high %v3415_v58, %v1417_v21, %v3438_v51  ;;  %v2151_v28 = vadd.s32 4294967294, %v1546_v26  ;;  %v1421_v39 = vsel %vm1407_vm6, %v1418_v38, %v1420_v0  ;;  %v3476_v21 = vld [vmem:[%s3847_s0] ss:$0 sm:$0xff] }
 0x1b7   : > { %v1689_v30 = vand.u32 2139095040, %v3423_v59  ;;  %v1565_v42 = vsel %vm1480_vm8, %v1564_v33, %v1540_v57  ;;  %v3447_v16 = vmul.u32.u64.low %v3415_v58, %v1421_v39  ;;  %v3448_v34 = vmul.u32.u64.high %v3415_v58, %v1421_v39, %v3447_v16 }
 0x1b8   : > { %vm1258_vm9 = vweird.f32 %v3174_v44  ;;  %vm3453_vm12 = vcmp.le.f32.partialorder %v1478_v20, 0.7853982  ;;  %vm2152_vm11 = vcmp.lt.s32.totalorder %v2151_v28, 0  ;;  %v1413_v23 = vsel %vm1407_vm6, %v1410_v50, %v1412_v52 }
 0x1b9   : > { %v1690_v35 = vshrl.u32 %v1689_v30, 23  ;;  %vm1261_vm13 = vcmp.lt.s32.totalorder %v1260_v47, 2  ;;  %v1534_v57 = vadd.s32 %v3374_v56, %v3379_v49  ;;  %v1549_v40 = vsel %vm2152_vm11, 0, %v2151_v28 }
 0x1ba   : > { %v1432_v41 = vadd.s32 1, %v3439_v43  ;;  %v1550_v45 = vsub.s32 32, %v1549_v40  ;;  %v1554_v18 = vsub.s32 4294967266, %v1549_v40  ;;  %v1567_v4 = vsel %vm3453_vm12, 0, %v1565_v42 }
 0x1bb   : > { %v2157_v20 = vadd.s32 4294967169, %v1690_v35  ;;  %v1551_v60 = vshll.u32 %v3413_v3, %v1549_v40  ;;  %v1429_v55 = vmul.u32 %v3415_v58, %v1413_v23  ;;  %vm1431_vm14 = vc.u32 %v3448_v34, %v3438_v51  ;;  %v272_v58 = vpop.permute.xlu0 %271 }
 0x1bc   : > { %v2329_v6 = vpop.eup %2328  ;;  %v1686_v10 = vand.u32 2147483647, %v3423_v59  ;;  %v1552_v49 = vshrl.u32 %v1534_v57, %v1550_v45  ;;  %v1555_v46 = vadd.s32 127, %v1554_v18  ;;  %v1433_v19 = vsel %vm1431_vm14, %v1432_v41, %v3439_v43 }
 0x1bd   : > { %v2331_v32 = vpop.eup %2330  ;;  %v1266_v56 = vxor.u32 2147483648, %v2329_v6  ;;  %vm1265_vm0 = vcmp.eq.s32.totalorder %v1260_v47, 2  ;;  %v1434_v1 = vadd.s32 %v1433_v19, %v1429_v55  ;;  %v1696_v22 = vadd.s32 1, %v2157_v20 }
 0x1be   : > { %v1263_v27 = vxor.u32 2147483648, %v2331_v32  ;;  %vm1262_vm15 = vcmp.eq.s32.totalorder %v1260_v47, 0  ;;  %v1553_v61 = vor.u32 %v1552_v49, %v1551_v60  ;;  %v1556_v3 = vshll.u32 %v1555_v46, 23 }
 0x1bf   : > { %v1267_v48 = vsel %vm1265_vm0, %v1266_v56, %v2331_v32  ;;  %v1571_v31 = vadd.s32 3, %v1567_v4  ;;  %v1435_v2 = vadd.s32 536870912, %v1434_v1  ;;  %vm1697_vm1 = vcmp.gt.s32.totalorder %v1696_v22, 0 }
 0x1c0   : > { %v1264_v12 = vsel %vm1262_vm15, %v2329_v6, %v1263_v27  ;;  %v1557_v25 = vor.u32 4788187, %v1556_v3  ;;  %v1693_v8 = vand.u32 8388607, %v1686_v10  ;;  %v1698_v9 = vsel %vm1697_vm1, %v1696_v22, 0 }
 0x1c1   : > { %v1268_v62 = vsel %vm1261_vm13, %v1264_v12, %v1267_v48  ;;  %v1436_v14 = vshrl.u32 %v1435_v2, 30  ;;  %v1700_v33 = vand.u32 31, %v1698_v9  ;;  %v307_v38 = vmul.f32 %v3476_v21, %v272_v58 }
 0x1c2   : > { %v1269_v63 = vsel %vm1258_vm9, nan, %v1268_v62  ;;  %v1558_v37 = vand.u32 2147483647, %v1557_v25  ;;  %v1560_v47 = vcvt.s32.f32 %v1553_v61  ;;  %vm1376_vm2 = vcmp.lt.s32.totalorder %v3313_v36, 0 }
 0x1c3   : > { %2006 = vst [vmem:[%s2819_s9 + $0x40] sm:$0xff] %v1269_v63  ;;  %v1437_v26 = vshll.u32 %v1436_v14, 30  ;;  %v1701_v50 = vsub.s32 32, %v1700_v33  ;;  %v3481_v0 = vand.u32 3, %v1571_v31  ;;  %v1430_v44 = vadd.s32 %v3438_v51, %v3448_v34 }
 0x1c4   : > { %v1561_v52 = vmul.f32 %v1560_v47, %v1558_v37  ;;  %v1694_v43 = vor.u32 8388608, %v1693_v8  ;;  %v3486_v39 = vshrl.u32 %v1698_v9, 5  ;;  %v3490_v42 = vadd.f32 %v3420_v54, %v307_v38 }
 0x1c5   : > { %v3484_v28 = vsub.s32 %v1434_v1, %v1437_v26  ;;  %v1704_v30 = vshrl.u32 %v2426_v11, %v1701_v50  ;;  %v1703_v23 = vshll.u32 %v2425_v7, %v1700_v33  ;;  %v1707_v35 = vshrl.u32 %v2427_v13, %v1701_v50 }
 0x1c6   : > { %v1562_v16 = vxor.u32 2147483648, %v1561_v52  ;;  %v1710_v57 = vshrl.u32 %v2428_v15, %v1701_v50  ;;  %v1706_v51 = vshll.u32 %v2426_v11, %v1700_v33  ;;  %v1709_v34 = vshll.u32 %v2427_v13, %v1700_v33 }
 0x1c7   : > { %v1440_v40 = vsub.s32 0, %v3484_v28  ;;  %v1713_v41 = vshrl.u32 %v2429_v17, %v1701_v50  ;;  %v1460_v18 = vsub.s32 4, %v1436_v14  ;;  %v1705_v4 = vor.u32 %v1704_v30, %v1703_v23 }
 0x1c8   : > { %v1563_v45 = vsel %vm1480_vm8, %v1562_v16, %v1561_v52  ;;  %v1712_v20 = vshll.u32 %v2428_v15, %v1700_v33  ;;  %v1708_v55 = vor.u32 %v1707_v35, %v1706_v51  ;;  %v1711_v32 = vor.u32 %v1710_v57, %v1709_v34 }
 0x1c9   : > { %v1566_v6 = vsel %vm3453_vm12, %v3283_v53, %v1563_v45  ;;  %v2146_v60 = vmin.u32 %v1440_v40, %v3484_v28  ;;  %v1715_v49 = vshll.u32 %v2429_v17, %v1700_v33  ;;  %v1716_v46 = vshrl.u32 %v2430_v24, %v1701_v50 }
 0x1ca   : > { %2332 = vcosq.f32 %v1566_v6  ;;  %v1714_v56 = vor.u32 %v1713_v41, %v1712_v20  ;;  %vm3510_vm3 = vcmp.le.f32.partialorder %v1374_v5, 0.7853982  ;;  %v3514_v29 = vshll.u32 %v1694_v43, 8 }
 0x1cb   : > { %2334 = vsinq.f32 %v1566_v6  ;;  %v1442_v27 = vclz %v2146_v60  ;;  %v1585_v1 = vand.u32 2139095040, %v3490_v42  ;;  %v1461_v22 = vsel %vm1376_vm2, %v1460_v18, %v1436_v14 }
 0x1cc   : > { %v1702_v48 = vshrl.u32 %v2425_v7, %v1701_v50  ;;  %v1717_v61 = vor.u32 %v1716_v46, %v1715_v49  ;;  %vm1718_vm4 = vcmp.lt.s32.totalorder %v3486_v39, 1  ;;  %vm1720_vm5 = vcmp.lt.s32.totalorder %v3486_v39, 3  ;;  %v287_v46 = vpop.permute.xlu1 %286 }
 0x1cd   : > { %v2147_v3 = vadd.s32 4294967294, %v1442_v27  ;;  %vm1721_vm6 = vcmp.lt.s32.totalorder %v3486_v39, 4  ;;  %v1726_v5 = vsel %vm1718_vm4, %v1705_v4, %v1708_v55  ;;  %v1730_v31 = vsel %vm1718_vm4, %v1708_v55, %v1711_v32 }
 0x1ce   : > { %v1723_v58 = vsel %vm1721_vm6, %v1711_v32, 2102212464  ;;  %v1727_v12 = vsel %vm1721_vm6, %v1714_v56, 920167782  ;;  %v1731_v2 = vsel %vm1721_vm6, %v1717_v61, 1326507024  ;;  %v1722_v9 = vsel %vm1718_vm4, %v1702_v48, %v1705_v4 }
 0x1cf   : > { %vm2148_vm7 = vcmp.lt.s32.totalorder %v2147_v3, 0  ;;  %vm1719_vm10 = vcmp.lt.s32.totalorder %v3486_v39, 2  ;;  %v1728_v62 = vsel %vm1720_vm5, %v1711_v32, %v1727_v12  ;;  %v1732_v25 = vsel %vm1720_vm5, %v1714_v56, %v1731_v2 }
 0x1d0   : > { %vm1573_vm8 = vcmp.lt.s32.totalorder %v3481_v0, 2  ;;  %v1445_v8 = vsel %vm2148_vm7, 0, %v2147_v3  ;;  %v1729_v63 = vsel %vm1719_vm10, %v1726_v5, %v1728_v62  ;;  %v1733_v14 = vsel %vm1719_vm10, %v1730_v31, %v1732_v25 }
 0x1d1   : > { %vm1570_vm9 = vweird.f32 %v3283_v53  ;;  %v1446_v33 = vsub.s32 32, %v1445_v8  ;;  %v1450_v38 = vsub.s32 4294967266, %v1445_v8  ;;  %v1724_v37 = vsel %vm1720_vm5, %v1708_v55, %v1723_v58 }
 0x1d2   : > { %v1586_v47 = vshrl.u32 %v1585_v1, 23  ;;  %v3537_v26 = vmul.u32.u64.low %v3514_v29, %v1733_v14  ;;  %v3538_v50 = vmul.u32.u64.high %v3514_v29, %v1733_v14, %v3537_v26  ;;  %v1447_v30 = vshll.u32 %v3484_v28, %v1445_v8 }
 0x1d3   : > { %v3541_v52 = vmul.u32.u64.low %v3514_v29, %v1729_v63  ;;  %v3542_v43 = vmul.u32.u64.high %v3514_v29, %v1729_v63, %v3541_v52  ;;  %v1448_v16 = vshrl.u32 %v1430_v44, %v1446_v33  ;;  %v1451_v23 = vadd.s32 127, %v1450_v38 }
 0x1d4   : > { %v2153_v35 = vadd.s32 4294967169, %v1586_v47  ;;  %v2333_v57 = vpop.eup %2332  ;;  %vm1574_vm12 = vcmp.eq.s32.totalorder %v3481_v0, 0  ;;  %vm1577_vm11 = vcmp.eq.s32.totalorder %v3481_v0, 2  ;;  %v1463_v40 = vsel %vm3510_vm3, 0, %v1461_v22 }
 0x1d5   : > { %v1725_v51 = vsel %vm1719_vm10, %v1722_v9, %v1724_v37  ;;  %v2335_v34 = vpop.eup %2334  ;;  %v1578_v41 = vxor.u32 2147483648, %v2333_v57  ;;  %v1449_v45 = vor.u32 %v1448_v16, %v1447_v30  ;;  %v1452_v18 = vshll.u32 %v1451_v23, 23 }
 0x1d6   : > { %v1592_v4 = vadd.s32 1, %v2153_v35  ;;  %v1575_v28 = vxor.u32 2147483648, %v2335_v34  ;;  %vm1743_vm13 = vc.u32 %v3538_v50, %v3541_v52  ;;  %v1744_v44 = vadd.s32 1, %v3542_v43 }
 0x1d7   : > { %v1582_v20 = vand.u32 2147483647, %v3490_v42  ;;  %v1579_v6 = vsel %vm1577_vm11, %v1578_v41, %v2335_v34  ;;  %v1453_v60 = vor.u32 4788187, %v1452_v18  ;;  %v1741_v55 = vmul.u32 %v3514_v29, %v1725_v51 }
 0x1d8   : > { %vm1593_vm14 = vcmp.gt.s32.totalorder %v1592_v4, 0  ;;  %v1576_v39 = vsel %vm1574_vm12, %v2333_v57, %v1575_v28  ;;  %v1467_v32 = vadd.s32 3, %v1463_v40  ;;  %v1745_v56 = vsel %vm1743_vm13, %v1744_v44, %v3542_v43 }
 0x1d9   : > { %v1594_v49 = vsel %vm1593_vm14, %v1592_v4, 0  ;;  %v1580_v27 = vsel %vm1573_vm8, %v1576_v39, %v1579_v6  ;;  %v1454_v1 = vand.u32 2147483647, %v1453_v60  ;;  %v1456_v22 = vcvt.s32.f32 %v1449_v45 }
 0x1da   : > { %v1746_v48 = vadd.s32 %v1745_v56, %v1741_v55  ;;  %v1581_v61 = vsel %vm1570_vm9, nan, %v1580_v27  ;;  %v1596_v3 = vand.u32 31, %v1594_v49  ;;  %v310_v58 = vmul.f32 %v3476_v21, %v287_v46 }
 0x1db   : > { %2009 = vst [vmem:[%s2819_s9 + $0x58] sm:$0xff] %v1581_v61  ;;  %v1457_v29 = vmul.f32 %v1456_v22, %v1454_v1  ;;  %v3566_v12 = vand.u32 3, %v1467_v32  ;;  %v1589_v31 = vand.u32 8388607, %v1582_v20  ;;  %v1595_v2 = vshrl.u32 %v1594_v49, 5  ;;  %v282_v22 = vpop.permute.xlu0 %281 }
 0x1dc   : > { %v1747_v5 = vadd.s32 536870912, %v1746_v48  ;;  %v1597_v0 = vsub.s32 32, %v1596_v3  ;;  %v1599_v8 = vshll.u32 %v2425_v7, %v1596_v3  ;;  %v1602_v53 = vshll.u32 %v2426_v11, %v1596_v3 }
 0x1dd   : > { %v1458_v62 = vxor.u32 2147483648, %v1457_v29  ;;  %v1605_v14 = vshll.u32 %v2427_v13, %v1596_v3  ;;  %v1608_v47 = vshll.u32 %v2428_v15, %v1596_v3  ;;  %v1590_v57 = vor.u32 8388608, %v1589_v31 }
 0x1de   : > { %v3570_v25 = vshrl.u32 %v1747_v5, 30  ;;  %v1600_v9 = vshrl.u32 %v2426_v11, %v1597_v0  ;;  %v1603_v63 = vshrl.u32 %v2427_v13, %v1597_v0  ;;  %v1606_v33 = vshrl.u32 %v2428_v15, %v1597_v0 }
 0x1df   : > { %v1459_v38 = vsel %vm1376_vm2, %v1458_v62, %v1457_v29  ;;  %v1609_v26 = vshrl.u32 %v2429_v17, %v1597_v0  ;;  %v1611_v51 = vshll.u32 %v2429_v17, %v1596_v3  ;;  %v1612_v34 = vshrl.u32 %v2430_v24, %v1597_v0 }
 0x1e0   : > { %v1749_v37 = vshll.u32 %v3570_v25, 30  ;;  %v1462_v43 = vsel %vm3510_vm3, %v3313_v36, %v1459_v38  ;;  %v1601_v30 = vor.u32 %v1600_v9, %v1599_v8  ;;  %v1604_v16 = vor.u32 %v1603_v63, %v1602_v53 }
 0x1e1   : > { %v1607_v23 = vor.u32 %v1606_v33, %v1605_v14  ;;  %2336 = vcosq.f32 %v1462_v43  ;;  %v1610_v40 = vor.u32 %v1609_v26, %v1608_v47  ;;  %v3591_v41 = vadd.f32 %v3420_v54, %v310_v58 }
 0x1e2   : > { %v3586_v35 = vsub.s32 %v1746_v48, %v1749_v37  ;;  %2338 = vsinq.f32 %v1462_v43  ;;  %vm1688_vm0 = vcmp.lt.s32.totalorder %v3423_v59, 0  ;;  %vm1614_vm15 = vcmp.lt.s32.totalorder %v1595_v2, 1 }
 0x1e3   : > { %vm1616_vm1 = vcmp.lt.s32.totalorder %v1595_v2, 3  ;;  %vm1617_vm2 = vcmp.lt.s32.totalorder %v1595_v2, 4  ;;  %v1613_v45 = vor.u32 %v1612_v34, %v1611_v51  ;;  %v1622_v4 = vsel %vm1614_vm15, %v1601_v30, %v1604_v16 }
 0x1e4   : > { %v1752_v19 = vsub.s32 0, %v3586_v35  ;;  %v1619_v18 = vsel %vm1617_vm2, %v1607_v23, 2102212464  ;;  %v1623_v28 = vsel %vm1617_vm2, %v1610_v40, 920167782  ;;  %v1598_v6 = vshrl.u32 %v2425_v7, %v1597_v0 }
 0x1e5   : > { %vm1615_vm3 = vcmp.lt.s32.totalorder %v1595_v2, 2  ;;  %v1624_v60 = vsel %vm1616_vm1, %v1607_v23, %v1623_v28  ;;  %v1626_v39 = vsel %vm1614_vm15, %v1604_v16, %v1607_v23  ;;  %v1627_v32 = vsel %vm1617_vm2, %v1613_v45, 1326507024 }
 0x1e6   : > { %v2158_v44 = vmin.u32 %v1752_v19, %v3586_v35  ;;  %v1625_v55 = vsel %vm1615_vm3, %v1622_v4, %v1624_v60  ;;  %v1630_v56 = vshll.u32 %v1590_v57, 8  ;;  %vm1469_vm4 = vcmp.lt.s32.totalorder %v3566_v12, 2 }
 0x1e7   : > { %vm1470_vm5 = vcmp.eq.s32.totalorder %v3566_v12, 0  ;;  %vm3605_vm6 = vcmp.le.f32.partialorder %v1686_v10, 0.7853982  ;;  %v1618_v27 = vsel %vm1614_vm15, %v1598_v6, %v1601_v30  ;;  %v1620_v1 = vsel %vm1616_vm1, %v1604_v16, %v1619_v18 }
 0x1e8   : > { %v1754_v46 = vclz %v2158_v44  ;;  %vm1466_vm7 = vweird.f32 %v3313_v36  ;;  %v1772_v48 = vsub.s32 4, %v3570_v25  ;;  %v1628_v61 = vsel %vm1616_vm1, %v1610_v40, %v1627_v32 }
 0x1e9   : > { %v3614_v3 = vmul.u32.u64.low %v1630_v56, %v1625_v55  ;;  %v3615_v29 = vmul.u32.u64.high %v1630_v56, %v1625_v55, %v3614_v3  ;;  %vm1473_vm10 = vcmp.eq.s32.totalorder %v3566_v12, 2  ;;  %v1629_v5 = vsel %vm1615_vm3, %v1626_v39, %v1628_v61 }
 0x1ea   : > { %v2159_v10 = vadd.s32 4294967294, %v1754_v46  ;;  %v1897_v58 = vand.u32 2139095040, %v3591_v41  ;;  %v1621_v31 = vsel %vm1615_vm3, %v1618_v27, %v1620_v1  ;;  %v309_v8 = vmul.f32 %v3476_v21, %v282_v22 }
 0x1eb   : > { %v3622_v0 = vmul.u32.u64.low %v1630_v56, %v1629_v5  ;;  %v3623_v62 = vmul.u32.u64.high %v1630_v56, %v1629_v5, %v3622_v0  ;;  %v2337_v53 = vpop.eup %2336  ;;  %v1742_v9 = vadd.s32 %v3541_v52, %v3538_v50  ;;  %v1894_v63 = vand.u32 2147483647, %v3591_v41 }
 0x1ec   : > { %vm2160_vm8 = vcmp.lt.s32.totalorder %v2159_v10, 0  ;;  %v1898_v14 = vshrl.u32 %v1897_v58, 23  ;;  %v2339_v33 = vpop.eup %2338  ;;  %v1474_v38 = vxor.u32 2147483648, %v2337_v53  ;;  %v1773_v2 = vsel %vm1688_vm0, %v1772_v48, %v3570_v25 }
 0x1ed   : > { %v1757_v37 = vsel %vm2160_vm8, 0, %v2159_v10  ;;  %v1640_v47 = vadd.s32 1, %v3615_v29  ;;  %v1471_v26 = vxor.u32 2147483648, %v2339_v33  ;;  %v1637_v30 = vmul.u32 %v1630_v56, %v1621_v31 }
 0x1ee   : > { %v1758_v43 = vsub.s32 32, %v1757_v37  ;;  %v1762_v21 = vsub.s32 4294967266, %v1757_v37  ;;  %v1475_v50 = vsel %vm1473_vm10, %v1474_v38, %v2339_v33  ;;  %v1759_v52 = vshll.u32 %v3586_v35, %v1757_v37 }
 0x1ef   : > { %vm1639_vm9 = vc.u32 %v3623_v62, %v3614_v3  ;;  %v2165_v16 = vadd.s32 4294967169, %v1898_v14  ;;  %v1472_v23 = vsel %vm1470_vm5, %v2337_v53, %v1471_v26  ;;  %v1775_v34 = vsel %vm3605_vm6, 0, %v1773_v2 }
 0x1f0   : > { %v1760_v25 = vshrl.u32 %v1742_v9, %v1758_v43  ;;  %v1763_v57 = vadd.s32 127, %v1762_v21  ;;  %v1641_v40 = vsel %vm1639_vm9, %v1640_v47, %v3615_v29  ;;  %v1476_v51 = vsel %vm1469_vm4, %v1472_v23, %v1475_v50 }
 0x1f1   : > { %v1642_v19 = vadd.s32 %v1641_v40, %v1637_v30  ;;  %v1904_v45 = vadd.s32 1, %v2165_v16  ;;  %v1477_v35 = vsel %vm1466_vm7, nan, %v1476_v51  ;;  %v1779_v6 = vadd.s32 3, %v1775_v34 }
 0x1f2   : > { %v1761_v18 = vor.u32 %v1760_v25, %v1759_v52  ;;  %v1764_v4 = vshll.u32 %v1763_v57, 23  ;;  %2008 = vst [vmem:[%s2819_s9 + $0x50] sm:$0xff] %v1477_v35  ;;  %v1901_v12 = vand.u32 8388607, %v1894_v63  ;;  %v3653_v32 = vadd.f32 %v3420_v54, %v309_v8 }
 0x1f3   : > { %v1643_v28 = vadd.s32 536870912, %v1642_v19  ;;  %vm1905_vm12 = vcmp.gt.s32.totalorder %v1904_v45, 0  ;;  %v3656_v22 = vand.u32 3, %v1779_v6  ;;  %v1638_v52 = vadd.s32 %v3614_v3, %v3623_v62 }
 0x1f4   : > { %v1765_v44 = vor.u32 4788187, %v1764_v4  ;;  %v1906_v60 = vsel %vm1905_vm12, %v1904_v45, 0  ;;  %v1768_v36 = vcvt.s32.f32 %v1761_v18  ;;  %v1902_v61 = vor.u32 8388608, %v1901_v12 }
 0x1f5   : > { %v3648_v55 = vshrl.u32 %v1643_v28, 30  ;;  %v1908_v39 = vand.u32 31, %v1906_v60  ;;  %v1793_v10 = vand.u32 2139095040, %v3653_v32  ;;  %v1907_v33 = vshrl.u32 %v1906_v60, 5 }
 0x1f6   : > { %v1766_v56 = vand.u32 2147483647, %v1765_v44  ;;  %v1942_v23 = vshll.u32 %v1902_v61, 8  ;;  %vm1781_vm2 = vcmp.lt.s32.totalorder %v3656_v22, 2  ;;  %vm1778_vm3 = vweird.f32 %v3423_v59 }
 0x1f7   : > { %v1645_v46 = vshll.u32 %v3648_v55, 30  ;;  %v1909_v27 = vsub.s32 32, %v1908_v39  ;;  %v1911_v58 = vshll.u32 %v2425_v7, %v1908_v39  ;;  %v1914_v8 = vshll.u32 %v2426_v11, %v1908_v39 }
 0x1f8   : > { %v1769_v1 = vmul.f32 %v1768_v36, %v1766_v56  ;;  %v1917_v53 = vshll.u32 %v2427_v13, %v1908_v39  ;;  %v1920_v37 = vshll.u32 %v2428_v15, %v1908_v39  ;;  %v1923_v30 = vshll.u32 %v2429_v17, %v1908_v39 }
 0x1f9   : > { %v3658_v48 = vsub.s32 %v1642_v19, %v1645_v46  ;;  %v1912_v29 = vshrl.u32 %v2426_v11, %v1909_v27  ;;  %v1915_v54 = vshrl.u32 %v2427_v13, %v1909_v27  ;;  %v1918_v31 = vshrl.u32 %v2428_v15, %v1909_v27 }
 0x1fa   : > { %v1770_v5 = vxor.u32 2147483648, %v1769_v1  ;;  %v1921_v9 = vshrl.u32 %v2429_v17, %v1909_v27  ;;  %v1924_v50 = vshrl.u32 %v2430_v24, %v1909_v27  ;;  %v1910_v25 = vshrl.u32 %v2425_v7, %v1909_v27 }
 0x1fb   : > { %v1648_v0 = vsub.s32 0, %v3658_v48  ;;  %v1913_v38 = vor.u32 %v1912_v29, %v1911_v58  ;;  %v1916_v26 = vor.u32 %v1915_v54, %v1914_v8  ;;  %v1919_v43 = vor.u32 %v1918_v31, %v1917_v53 }
 0x1fc   : > { %v1771_v14 = vsel %vm1688_vm0, %v1770_v5, %v1769_v1  ;;  %v1922_v21 = vor.u32 %v1921_v9, %v1920_v37  ;;  %v1925_v49 = vor.u32 %v1924_v50, %v1923_v30  ;;  %vm1926_vm11 = vcmp.lt.s32.totalorder %v1907_v33, 1 }
 0x1fd   : > { %v1774_v2 = vsel %vm3605_vm6, %v3423_v59, %v1771_v14  ;;  %v2154_v47 = vmin.u32 %v1648_v0, %v3658_v48  ;;  %v1794_v57 = vshrl.u32 %v1793_v10, 23  ;;  %vm1928_vm13 = vcmp.lt.s32.totalorder %v1907_v33, 3 }
 0x1fe   : > { %2340 = vcosq.f32 %v1774_v2  ;;  %vm1929_vm14 = vcmp.lt.s32.totalorder %v1907_v33, 4  ;;  %v1934_v51 = vsel %vm1926_vm11, %v1913_v38, %v1916_v26  ;;  %v1938_v45 = vsel %vm1926_vm11, %v1916_v26, %v1919_v43 }
 0x1ff   : > { %2342 = vsinq.f32 %v1774_v2  ;;  %v1650_v16 = vclz %v2154_v47  ;;  %v1931_v34 = vsel %vm1929_vm14, %v1919_v43, 2102212464  ;;  %v1935_v19 = vsel %vm1929_vm14, %v1922_v21, 920167782 }
 0x200   : > { %v1939_v35 = vsel %vm1929_vm14, %v1925_v49, 1326507024  ;;  %vm1584_vm0 = vcmp.lt.s32.totalorder %v3490_v42, 0  ;;  %vm1927_vm1 = vcmp.lt.s32.totalorder %v1907_v33, 2  ;;  %v1936_v3 = vsel %vm1928_vm13, %v1919_v43, %v1935_v19 }
 0x201   : > { %v2155_v40 = vadd.s32 4294967294, %v1650_v16  ;;  %v1940_v62 = vsel %vm1928_vm13, %v1922_v21, %v1939_v35  ;;  %v1930_v4 = vsel %vm1926_vm11, %v1910_v25, %v1913_v38  ;;  %v1937_v28 = vsel %vm1927_vm1, %v1934_v51, %v1936_v3 }
 0x202   : > { %v1941_v44 = vsel %vm1927_vm1, %v1938_v45, %v1940_v62  ;;  %v1932_v12 = vsel %vm1928_vm13, %v1916_v26, %v1931_v34  ;;  %v2161_v39 = vadd.s32 4294967169, %v1794_v57  ;;  %vm1782_vm4 = vcmp.eq.s32.totalorder %v3656_v22, 0 }
 0x203   : > { %vm2156_vm15 = vcmp.lt.s32.totalorder %v2155_v40, 0  ;;  %v3692_v56 = vmul.u32.u64.low %v1942_v23, %v1941_v44  ;;  %v3693_v36 = vmul.u32.u64.high %v1942_v23, %v1941_v44, %v3692_v56  ;;  %vm1785_vm5 = vcmp.eq.s32.totalorder %v3656_v22, 2 }
 0x204   : > { %v1653_v18 = vsel %vm2156_vm15, 0, %v2155_v40  ;;  %v3695_v46 = vmul.u32.u64.low %v1942_v23, %v1937_v28  ;;  %v3696_v27 = vmul.u32.u64.high %v1942_v23, %v1937_v28, %v3695_v46  ;;  %v1800_v10 = vadd.s32 1, %v2161_v39 }
 0x205   : > { %v1654_v6 = vsub.s32 32, %v1653_v18  ;;  %v1658_v60 = vsub.s32 4294967266, %v1653_v18  ;;  %v1655_v1 = vshll.u32 %v3658_v48, %v1653_v18  ;;  %v1668_v58 = vsub.s32 4, %v3648_v55 }
 0x206   : > { %v1933_v54 = vsel %vm1927_vm1, %v1930_v4, %v1932_v12  ;;  %vm1801_vm6 = vcmp.gt.s32.totalorder %v1800_v10, 0  ;;  %vm1951_vm7 = vc.u32 %v3693_v36, %v3695_v46  ;;  %v1952_v48 = vadd.s32 1, %v3696_v27 }
 0x207   : > { %v1656_v61 = vshrl.u32 %v1638_v52, %v1654_v6  ;;  %v1659_v29 = vadd.s32 127, %v1658_v60  ;;  %v1790_v14 = vand.u32 2147483647, %v3653_v32  ;;  %v1949_v2 = vmul.u32 %v1942_v23, %v1933_v54 }
 0x208   : > { %v2341_v5 = vpop.eup %2340  ;;  %v1802_v47 = vsel %vm1801_vm6, %v1800_v10, 0  ;;  %v1669_v26 = vsel %vm1584_vm0, %v1668_v58, %v3648_v55  ;;  %v1953_v43 = vsel %vm1951_vm7, %v1952_v48, %v3696_v27  ;;  %vm3720_vm10 = vcmp.le.f32.partialorder %v1582_v20, 0.7853982 }
 0x209   : > { %v2343_v31 = vpop.eup %2342  ;;  %v1786_v0 = vxor.u32 2147483648, %v2341_v5  ;;  %v1657_v8 = vor.u32 %v1656_v61, %v1655_v1  ;;  %v1660_v53 = vshll.u32 %v1659_v29, 23  ;;  %v1804_v21 = vand.u32 31, %v1802_v47 }
 0x20a   : > { %v1783_v9 = vxor.u32 2147483648, %v2343_v31  ;;  %v1954_v16 = vadd.s32 %v1953_v43, %v1949_v2  ;;  %v1797_v55 = vand.u32 8388607, %v1790_v14  ;;  %v1671_v22 = vsel %vm3720_vm10, 0, %v1669_v26 }
 0x20b   : > { %v1787_v38 = vsel %vm1785_vm5, %v1786_v0, %v2343_v31  ;;  %v1661_v37 = vor.u32 4788187, %v1660_v53  ;;  %v1664_v52 = vcvt.s32.f32 %v1657_v8  ;;  %v1805_v49 = vsub.s32 32, %v1804_v21 }
 0x20c   : > { %v1784_v33 = vsel %vm1782_vm4, %v2341_v5, %v1783_v9  ;;  %v1955_v40 = vadd.s32 536870912, %v1954_v16  ;;  %v1803_v51 = vshrl.u32 %v1802_v47, 5  ;;  %v1807_v59 = vshll.u32 %v2425_v7, %v1804_v21 }
 0x20d   : > { %v1788_v30 = vsel %vm1781_vm2, %v1784_v33, %v1787_v38  ;;  %v1662_v50 = vand.u32 2147483647, %v1661_v37  ;;  %v1808_v34 = vshrl.u32 %v2426_v11, %v1805_v49  ;;  %v1810_v20 = vshll.u32 %v2426_v11, %v1804_v21 }
 0x20e   : > { %v1789_v23 = vsel %vm1778_vm3, nan, %v1788_v30  ;;  %v1811_v19 = vshrl.u32 %v2427_v13, %v1805_v49  ;;  %v3733_v35 = vshrl.u32 %v1955_v40, 30  ;;  %v1814_v3 = vshrl.u32 %v2428_v15, %v1805_v49 }
 0x20f   : > { %2011 = vst [vmem:[%s2819_s9 + $0x68] sm:$0xff] %v1789_v23  ;;  %v1665_v57 = vmul.f32 %v1664_v52, %v1662_v50  ;;  %v1817_v62 = vshrl.u32 %v2429_v17, %v1805_v49  ;;  %v1813_v18 = vshll.u32 %v2427_v13, %v1804_v21  ;;  %v1816_v4 = vshll.u32 %v2428_v15, %v1804_v21 }
 0x210   : > { %v1819_v28 = vshll.u32 %v2429_v17, %v1804_v21  ;;  %v1820_v44 = vshrl.u32 %v2430_v24, %v1805_v49  ;;  %v1957_v6 = vshll.u32 %v3733_v35, 30  ;;  %v1809_v60 = vor.u32 %v1808_v34, %v1807_v59 }
 0x211   : > { %v1666_v45 = vxor.u32 2147483648, %v1665_v57  ;;  %v1812_v12 = vor.u32 %v1811_v19, %v1810_v20  ;;  %v1818_v56 = vor.u32 %v1817_v62, %v1816_v4  ;;  %v1815_v15 = vor.u32 %v1814_v3, %v1813_v18 }
 0x212   : > { %v1821_v27 = vor.u32 %v1820_v44, %v1819_v28  ;;  %v1958_v13 = vsub.s32 %v1954_v16, %v1957_v6  ;;  %v1675_v17 = vadd.s32 3, %v1671_v22  ;;  %v1798_v1 = vor.u32 8388608, %v1797_v55 }
 0x213   : > { %v1667_v11 = vsel %vm1584_vm0, %v1666_v45, %v1665_v57  ;;  %vm1822_vm8 = vcmp.lt.s32.totalorder %v1803_v51, 1  ;;  %v1806_v61 = vshrl.u32 %v2425_v7, %v1805_v49  ;;  %vm1825_vm9 = vcmp.lt.s32.totalorder %v1803_v51, 4 }
 0x214   : > { %v1670_v39 = vsel %vm3720_vm10, %v3490_v42, %v1667_v11  ;;  %v1960_v24 = vsub.s32 0, %v1958_v13  ;;  %v1830_v29 = vsel %vm1822_vm8, %v1809_v60, %v1812_v12  ;;  %vm1823_vm12 = vcmp.lt.s32.totalorder %v1803_v51, 2 }
 0x215   : > { %2344 = vcosq.f32 %v1670_v39  ;;  %vm1824_vm11 = vcmp.lt.s32.totalorder %v1803_v51, 3  ;;  %v1831_v10 = vsel %vm1825_vm9, %v1818_v56, 920167782  ;;  %v1835_v5 = vsel %vm1825_vm9, %v1821_v27, 1326507024 }
 0x216   : > { %2346 = vsinq.f32 %v1670_v39  ;;  %v2166_v58 = vmin.u32 %v1960_v24, %v1958_v13  ;;  %v1827_v54 = vsel %vm1825_vm9, %v1815_v15, 2102212464  ;;  %v1832_v31 = vsel %vm1824_vm11, %v1815_v15, %v1831_v10 }
 0x217   : > { %v1834_v0 = vsel %vm1822_vm8, %v1812_v12, %v1815_v15  ;;  %v1833_v8 = vsel %vm1823_vm12, %v1830_v29, %v1832_v31  ;;  %v1836_v53 = vsel %vm1824_vm11, %v1818_v56, %v1835_v5  ;;  %v1838_v9 = vshll.u32 %v1798_v1, 8 }
 0x218   : > { %v1676_v48 = vand.u32 3, %v1675_v17  ;;  %v1962_v38 = vclz %v2166_v58  ;;  %v1826_v7 = vsel %vm1822_vm8, %v1806_v61, %v1809_v60  ;;  %v1828_v37 = vsel %vm1824_vm11, %v1812_v12, %v1827_v54 }
 0x219   : > { %v1837_v2 = vsel %vm1823_vm12, %v1834_v0, %v1836_v53  ;;  %v3753_v47 = vmul.u32.u64.low %v1838_v9, %v1833_v8  ;;  %v3754_v33 = vmul.u32.u64.high %v1838_v9, %v1833_v8, %v3753_v47  ;;  %v1829_v50 = vsel %vm1823_vm12, %v1826_v7, %v1828_v37 }
 0x21a   : > { %v2167_v26 = vadd.s32 4294967294, %v1962_v38  ;;  %v3756_v43 = vmul.u32.u64.low %v1838_v9, %v1837_v2  ;;  %v3757_v21 = vmul.u32.u64.high %v1838_v9, %v1837_v2, %v3756_v43  ;;  %vm1677_vm13 = vcmp.lt.s32.totalorder %v1676_v48, 2 }
 0x21b   : > { %vm1678_vm14 = vcmp.eq.s32.totalorder %v1676_v48, 0  ;;  %vm1681_vm15 = vcmp.eq.s32.totalorder %v1676_v48, 2  ;;  %v1848_v25 = vadd.s32 1, %v3754_v33  ;;  %v1950_v49 = vadd.s32 %v3695_v46, %v3693_v36 }
 0x21c   : > { %vm2168_vm0 = vcmp.lt.s32.totalorder %v2167_v26, 0  ;;  %v1845_v34 = vmul.u32 %v1838_v9, %v1829_v50  ;;  %vm1847_vm1 = vc.u32 %v3757_v21, %v3753_v47  ;;  %vm1674_vm2 = vweird.f32 %v3490_v42 }
 0x21d   : > { %v1965_v23 = vsel %vm2168_vm0, 0, %v2167_v26  ;;  %v1849_v45 = vsel %vm1847_vm1, %v1848_v25, %v3754_v33  ;;  %v1980_v39 = vsub.s32 4, %v3733_v35  ;;  %vm1896_vm3 = vcmp.lt.s32.totalorder %v3591_v41, 0 }
 0x21e   : > { %v1966_v57 = vsub.s32 32, %v1965_v23  ;;  %v1970_v22 = vsub.s32 4294967266, %v1965_v23  ;;  %v1967_v59 = vshll.u32 %v1958_v13, %v1965_v23  ;;  %v1850_v62 = vadd.s32 %v1849_v45, %v1845_v34 }
 0x21f   : > { %v2345_v30 = vpop.eup %2344  ;;  %vm1895_vm4 = vcmp.le.f32.partialorder %v1894_v63, 0.7853982  ;;  %v1981_v15 = vsel %vm1896_vm3, %v1980_v39, %v3733_v35  ;;  %v1846_v58 = vadd.s32 %v3753_v47, %v3757_v21  ;;  %vm1986_vm8 = vweird.f32 %v3591_v41 }
 0x220   : > { %v2347_v52 = vpop.eup %2346  ;;  %v1682_v16 = vxor.u32 2147483648, %v2345_v30  ;;  %v1968_v20 = vshrl.u32 %v1950_v49, %v1966_v57  ;;  %v1971_v19 = vadd.s32 127, %v1970_v22  ;;  %v1851_v4 = vadd.s32 536870912, %v1850_v62 }
 0x221   : > { %v1679_v55 = vxor.u32 2147483648, %v2347_v52  ;;  %v1983_v24 = vsel %vm1895_vm4, 0, %v1981_v15  ;;  %vm1792_vm9 = vcmp.lt.s32.totalorder %v3653_v32, 0  ;;  %vm1791_vm12 = vcmp.le.f32.partialorder %v1790_v14, 0.7853982 }
 0x222   : > { %v1683_v40 = vsel %vm1681_vm15, %v1682_v16, %v2347_v52  ;;  %v1969_v46 = vor.u32 %v1968_v20, %v1967_v59  ;;  %v1972_v18 = vshll.u32 %v1971_v19, 23  ;;  %v1852_v44 = vshrl.u32 %v1851_v4, 30 }
 0x223   : > { %v1680_v51 = vsel %vm1678_vm14, %v2345_v30, %v1679_v55  ;;  %v1987_v10 = vadd.s32 3, %v1983_v24  ;;  %vm1882_vm0 = vweird.f32 %v3653_v32 }
 0x224   : > { %v1684_v3 = vsel %vm1677_vm13, %v1680_v51, %v1683_v40  ;;  %v1973_v28 = vor.u32 4788187, %v1972_v18  ;;  %v1976_v6 = vcvt.s32.f32 %v1969_v46  ;;  %v1853_v60 = vshll.u32 %v1852_v44, 30 }
 0x225   : > { %v1685_v36 = vsel %vm1674_vm2, nan, %v1684_v3  ;;  %v1988_v0 = vand.u32 3, %v1987_v10  ;;  %v1876_v52 = vsub.s32 4, %v1852_v44 }
 0x226   : > { %2010 = vst [vmem:[%s2819_s9 + $0x60] sm:$0xff] %v1685_v36  ;;  %v1974_v11 = vand.u32 2147483647, %v1973_v28  ;;  %v1854_v56 = vsub.s32 %v1850_v62, %v1853_v60 }
 0x227   : > { %vm1993_vm6 = vcmp.eq.s32.totalorder %v1988_v0, 2  ;;  %vm1990_vm7 = vcmp.eq.s32.totalorder %v1988_v0, 0  ;;  %vm1989_vm10 = vcmp.lt.s32.totalorder %v1988_v0, 2  ;;  %v1877_v25 = vsel %vm1792_vm9, %v1876_v52, %v1852_v44 }
 0x228   : > { %v1977_v12 = vmul.f32 %v1976_v6, %v1974_v11  ;;  %v1856_v42 = vsub.s32 0, %v1854_v56  ;;  %v1879_v49 = vsel %vm1791_vm12, 0, %v1877_v25 }
 0x22a   : > { %v1978_v27 = vxor.u32 2147483648, %v1977_v12  ;;  %v2162_v1 = vmin.u32 %v1856_v42, %v1854_v56 }
 0x22c   : > { %v1979_v13 = vsel %vm1896_vm3, %v1978_v27, %v1977_v12  ;;  %v1858_v61 = vclz %v2162_v1 }
 0x22d   : > { %v1982_v17 = vsel %vm1895_vm4, %v3591_v41, %v1979_v13  ;;  %v1883_v41 = vadd.s32 3, %v1879_v49 }
 0x22e   : > { %2348 = vcosq.f32 %v1982_v17  ;;  %v2163_v29 = vadd.s32 4294967294, %v1858_v61 }
 0x22f   : > { %2350 = vsinq.f32 %v1982_v17  ;;  %v1884_v57 = vand.u32 3, %v1883_v41 }
 0x230   : > { %vm2164_vm5 = vcmp.lt.s32.totalorder %v2163_v29, 0 }
 0x231   : > { %v1861_v5 = vsel %vm2164_vm5, 0, %v2163_v29  ;;  %vm1889_vm11 = vcmp.eq.s32.totalorder %v1884_v57, 2  ;;  %vm1886_vm13 = vcmp.eq.s32.totalorder %v1884_v57, 0  ;;  %vm1885_vm14 = vcmp.lt.s32.totalorder %v1884_v57, 2 }
 0x232   : > { %v1862_v54 = vsub.s32 32, %v1861_v5  ;;  %v1866_v31 = vsub.s32 4294967266, %v1861_v5  ;;  %v1863_v63 = vshll.u32 %v1854_v56, %v1861_v5 }
 0x234   : > { %v1864_v8 = vshrl.u32 %v1846_v58, %v1862_v54  ;;  %v1867_v53 = vadd.s32 127, %v1866_v31 }
 0x236   : > { %v1865_v38 = vor.u32 %v1864_v8, %v1863_v63  ;;  %v1868_v7 = vshll.u32 %v1867_v53, 23 }
 0x238   : > { %v2349_v35 = vpop.eup %2348  ;;  %v1869_v33 = vor.u32 4788187, %v1868_v7  ;;  %v1872_v21 = vcvt.s32.f32 %v1865_v38 }
 0x239   : > { %v2351_v9 = vpop.eup %2350  ;;  %v1994_v48 = vxor.u32 2147483648, %v2349_v35 }
 0x23a   : > { %v1991_v37 = vxor.u32 2147483648, %v2351_v9  ;;  %v1870_v43 = vand.u32 2147483647, %v1869_v33 }
 0x23b   : > { %v1995_v2 = vsel %vm1993_vm6, %v1994_v48, %v2351_v9 }
 0x23c   : > { %v1992_v26 = vsel %vm1990_vm7, %v2349_v35, %v1991_v37  ;;  %v1873_v50 = vmul.f32 %v1872_v21, %v1870_v43 }
 0x23d   : > { %v1996_v47 = vsel %vm1989_vm10, %v1992_v26, %v1995_v2 }
 0x23e   : > { %v1997_v30 = vsel %vm1986_vm8, nan, %v1996_v47  ;;  %v1874_v16 = vxor.u32 2147483648, %v1873_v50 }
 0x23f   : > { %2013 = vst [vmem:[%s2819_s9 + $0x78] sm:$0xff] %v1997_v30 }
 0x240   : > { %v1875_v23 = vsel %vm1792_vm9, %v1874_v16, %v1873_v50 }
 0x241   : > { %v1878_v55 = vsel %vm1791_vm12, %v3653_v32, %v1875_v23 }
 0x242   : > { %2352 = vcosq.f32 %v1878_v55 }
 0x243   : > { %2354 = vsinq.f32 %v1878_v55 }
 0x24c   : > { %v2353_v22 = vpop.eup %2352 }
 0x24d   : > { %v2355_v40 = vpop.eup %2354  ;;  %v1890_v59 = vxor.u32 2147483648, %v2353_v22  ;;  %2021 = sbr.rel (!%p2492_p5) target bundleno = 624 (0x270), region = 36 }
 0x24e   : > { %v1887_v34 = vxor.u32 2147483648, %v2355_v40 }
 0x24f   : > { %v1891_v51 = vsel %vm1889_vm11, %v1890_v59, %v2355_v40 }
 0x250   : > { %v1888_v14 = vsel %vm1886_vm13, %v2353_v22, %v1887_v34 }
 0x251   : > { %v1892_v20 = vsel %vm1885_vm14, %v1888_v14, %v1891_v51 }
 0x252   : > { %v1893_v19 = vsel %vm1882_vm0, nan, %v1892_v20 }
 0x253   : > { %2012 = vst [vmem:[%s2819_s9 + $0x70] sm:$0xff] %v1893_v19 }
 0x254   : > { %s3886_s29 = smov (!%p2024_p11, %s2023_s29), 16 }
 0x255   : > { %s3791_s4 = sshll.u32 %s3886_s29, 7 }
 0x256   : > { %s2028_s5 = ssub.s32 2048, %s3791_s4 }
 0x257   : > { %2029 = vsyncadd %s3786_s28, %s2028_s5  ;;  %p2172_p12 = scmp.ne.s32.totalorder %s3791_s4, 0  ;;  %s2178_s30 = sshll.u32 %s2475_s16, 11 }
 0x258   : > { %s3800_s7 = scalar_lea.hbm %s3850_s3, %s2178_s30  ;;  %s2034_s24 = sshll.u32 %s2819_s9, 4  ;;  %s3803_s24 = int_to_ptr.vmem [resolvable:$true] %s2034_s24 }
 0x259   : > { %s2360_s8 = scalar_lea.vmem %s3803_s24, %s3791_s4  ;;  %s2431_s10 = smov [#allocation2]  }
 0x25a   : > { %p2361_p13 = scmp.ne.s32.totalorder %s3803_s24, %s2360_s8  ;;  %s2364_s11 = sshll.u32 %s2431_s10, 4  ;;  %s2365_s11 = int_to_ptr.vmem [resolvable:$false] %s2364_s11 }
 0x25b   : > { %s2366_s16 = scalar_lea.vmem %s2365_s11, 4096  ;;  %p2367_p2 = scmp.lt.s32.totalorder %s3803_s24, %s2365_s11 }
 0x25c   : > { %p2362_p0 = pnand %p2361_p13, %p2172_p12  ;;  %p2368_p3 = scmp.lt.s32.totalorder %s2366_s16, %s2360_s8 }
 0x25e   : > { %p2363_p1 = pneg %p2362_p0  ;;  %p2369_p4 = por %p2368_p3, %p2367_p2 }
 0x260   : > { %p2370_p5 = pnand %p2369_p4, %p2363_p1 }
 0x262   : > { %2373 = shalt.err (!%p2370_p5)
}
 0x263   : > { %s2374_s9 = scalar_lea.hbm %s3800_s7, %s3791_s4  ;;  %s2378_s20 = scalar_lea.hbm %s3850_s3, 4864 }
 0x264   : > { %p2375_p7 = scmp.ne.s32.totalorder %s3800_s7, %s2374_s9  ;;  %p2379_p10 = scmp.lt.u32.totalorder %s3800_s7, %s3850_s3 }
 0x265   : > { %p2380_p11 = scmp.lt.u32.totalorder %s2378_s20, %s2374_s9  ;;  %p2382_p0 = scmp.lt.u32.totalorder %s2374_s9, %s3800_s7 }
 0x266   : > { %p2376_p8 = pnand %p2375_p7, %p2172_p12 }
 0x267   : > { %p2381_p13 = por %p2380_p11, %p2379_p10 }
 0x268   : > { %p2377_p9 = pneg %p2376_p8 }
 0x269   : > { %p2383_p1 = por %p2382_p0, %p2381_p13 }
 0x26b   : > { %p2384_p2 = pnand %p2383_p1, %p2377_p9 }
 0x26d   : > { %2387 = shalt.err (!%p2384_p2)
}
 0x26e   : > { %s2432_s27 = smov 128   ;;  %s2433_s29 = smov 8  }
 0x26f   : > { %2040 = dma.vmem_to_hbm [thread:$0]  (%p2172_p12), %s3803_s24, %s3791_s4, %s3800_s7, %s3786_s28, %s2432_s27, %s2432_s27, %s2433_s29  }
 0x270 PF: > { %p2248_p3 = scmp.ge.s32.totalorder %s2422_s15, 2  ;;  %s2049_s5 = sand.u32 1, %s2410_s12  }
 0x271   : > { %s2050_s30 = scalar_lea.sflag [#allocation3], %s2049_s5 }
 0x272   : > { %p2245_p4 = pnand %p2248_p3, %p2496_p6 }
 0x274   : > { %2405 = dma.done.wait (!%p2245_p4), %s2050_s30, 2048  }
 0x275   : > { %2407 = vsyncadd (!%p2245_p4), %s2050_s30, 4294965248  ;;  %p13_p5 = scmp.ge.s32.totalorder %s2479_s18, 5   ;;  %s3881_s12 = smov %s2414_s13 }
 0x276   : > { %s3882_s13 = smov %s2418_s14  ;;  %s3883_s14 = smov %s2490_s21 }
 0x277   : > { %s3884_s15 = smov %s2479_s18  ;;  %15 = sbr.rel (!%p13_p5) target bundleno = 3 (0x3), region = 67 }
 0x27e   :  { %2055 = vsyncpa [#allocation3], 1 }
 0x27f   :  { %2057 = vsyncpa [#allocation3 + $0x1], 1 }

</bundles_post_ra>
